<compile_context>
chip_gen: v7x
topology: tpu7x:2x2x1
jax: 0.10.0
libtpu: 0.0.40
codegen_flags: <defaults>
</compile_context>

<pallas_src>
import functools

import jax
import jax.numpy as jnp
from jax import lax
from jax.experimental import pallas as pl
from jax.experimental.pallas import tpu as pltpu


def _feature_centers_kernel(x_ref, w_ref, sm_ref, ctr_ref, x_scr, *, H, W, pad):
    """Processes `bb` batch elements per grid step.

    x_ref:   (bb, C, H*W)          channel-major flattened image (unpadded)
    w_ref:   (K, 80)               conv weights: row = tap*8 + c, col 72 = bias
    sm_ref:  (bb, K, H*W)          softmax(conv(x))            (lane-dense)
    ctr_ref: (bb, K, 128)          centers in lanes [:C], rest zero (lane-dense)
    x_scr:   (8, pad + H*W + pad)  VMEM scratch: sublane/lane zero-padded image
    """
    bb, C, _ = x_ref.shape
    K = sm_ref.shape[1]
    HW = H * W
    inv_hw = 1.0 / float(HW)

    w = w_ref[...]                                       # (K, 80)

    # Column-edge validity masks in output coordinates, built once at (8, HW)
    # so the per-tap selects need no re-broadcast.
    col = jax.lax.broadcasted_iota(jnp.int32, (8, HW), 1) % W
    left_ok = col >= 1          # tap reads one column to the left
    right_ok = col <= W - 2     # tap reads one column to the right

    # Ones row (sublane 0 of the 10th chunk) pairing with the folded bias
    # column (72) of the weights.
    ones_chunk = (jax.lax.broadcasted_iota(jnp.int32, (8, HW), 0) == 0
                  ).astype(jnp.float32)

    # Zero the scratch EVERY step (not only at step 0: with a "parallel" grid
    # each TensorCore owns its own scratch instance). This provides both the
    # lane padding (row over/underflow) and the zero sublane rows C..7.
    x_scr[...] = jnp.zeros_like(x_scr)

    # TODO(synk): if bb is ever made > 2 (large-batch single-TC path), switch
    #             this unrolled Python loop to lax.fori_loop / an extra grid
    #             axis to bound vreg live ranges.
    for b in range(bb):
        x_scr[0:C, pad:pad + HW] = x_ref[b]              # aligned center write
        xp = x_scr[...]                                  # (8, HW + 2*pad)

        # im2col operand: 9 statically shifted lane slices (each already
        # 8 sublanes tall) + the ones chunk -> (80, HW); one MXU pass with
        # contraction 80. Row over/underflow reads zeros from the lane pad;
        # column wrap is masked.
        taps = []
        for dy in range(3):
            for dx in range(3):
                s = (dy - 1) * W + (dx - 1)
                t = xp[:, pad + s:pad + s + HW]          # (8, HW)
                if dx == 0:
                    t = jnp.where(left_ok, t, 0.0)
                elif dx == 2:
                    t = jnp.where(right_ok, t, 0.0)
                taps.append(t)
        taps.append(ones_chunk)
        xs = jnp.concatenate(taps, axis=0)               # (80, HW)

        # Fused 3x3 conv + bias as a single MXU matmul.
        conv = jnp.dot(w, xs, preferred_element_type=jnp.float32,
                       precision=lax.Precision.HIGHEST)  # (K, HW)

        # Softmax over classes: K lives on the sublane axis, so the reduce is
        # a tiny K-row reduce; the rest is full-lane-width VPU/EUP work.
        m = jnp.max(conv, axis=0, keepdims=True)
        e = jnp.exp(conv - m)
        denom = jnp.sum(e, axis=0, keepdims=True)
        # approx=True would be cheaper but its ~2^-12 relative error breaks
        # the 1e-5 comparison against the exact reference.
        p = e * pl.reciprocal(denom, approx=False)       # (K, HW)
        sm_ref[b] = p                                    # lane-dense store

        # Per-class feature centers: contraction over H*W on the last (lane)
        # axis of BOTH operands -> transposed-RHS MXU path, no materialized
        # transpose. Rows C..7 of x8 are zero, so columns C..7 of ctr are 0.
        x8 = xp[:, pad:pad + HW]                         # (8, HW), aligned slice
        ctr = lax.dot_general(
            p, x8, dimension_numbers=(((1,), (1,)), ((), ())),
            preferred_element_type=jnp.float32,
            precision=lax.Precision.HIGHEST)             # (K, 8)
        ctr = ctr * inv_hw
        # Lane-pad to 128 so the block writeback is lane-dense.
        ctr_ref[b] = jnp.concatenate(
            [ctr, jnp.zeros((K, 128 - ctr.shape[1]), jnp.float32)], axis=1)


def _tensorcores_per_chip() -> int:
    """2 on v7x (megacore split useful), otherwise 1 (v5e/v6e single TC)."""
    try:
        kind = jax.devices()[0].device_kind.lower()
    except Exception:
        return 1
    return 2 if ("v7" in kind or "7x" in kind) else 1


@functools.partial(jax.jit, static_argnames=("tc_per_chip",))
def feature_centers_core(x_nchw, weight, bias, *, tc_per_chip=1):
    """x_nchw: (B, C, H, W); weight: (K, C, 3, 3) OIHW; bias: (K,).

    Returns (softmax (B, K, H, W), centers (B, K, C))."""
    B, C, H, W = x_nchw.shape
    K = weight.shape[0]
    HW = H * W
    assert C <= 8, "im2col packing assumes C <= 8 (one sublane tile per tap)"
    PAD = 128 * ((W + 1 + 127) // 128)   # lane padding >= max tap shift (W+1)

    # Layout plumbing: free reshape only (no wrapper pad, no NCHW<->NHWC
    # transposes of x).
    x_flat = x_nchw.reshape(B, C, HW).astype(jnp.float32)

    # Conv weights -> (K, 80): row = (dy*3+dx)*8 + c (rows C..7 per tap zero),
    # bias folded into column 72 (pairs with the ones-row chunk in-kernel).
    w_taps = jnp.transpose(weight, (0, 2, 3, 1)).reshape(K, 9, C)
    w_pack = jnp.zeros((K, 10, 8), jnp.float32)
    w_pack = w_pack.at[:, :9, :C].set(w_taps.astype(jnp.float32))
    w_pack = w_pack.at[:, 9, 0].set(bias.astype(jnp.float32))
    w_flat = w_pack.reshape(K, 80)

    # Generation-aware batch split: one grid step for the whole batch on
    # single-TC chips; two "parallel" steps on v7x so both TensorCores run.
    if tc_per_chip >= 2 and B >= 2 and B % 2 == 0:
        bb = B // 2
    else:
        bb = B
    n_steps = B // bb

    kernel = functools.partial(_feature_centers_kernel, H=H, W=W, pad=PAD)
    sm_flat, ctr_pad = pl.pallas_call(
        kernel,
        out_shape=(
            jax.ShapeDtypeStruct((B, K, HW), jnp.float32),
            jax.ShapeDtypeStruct((B, K, 128), jnp.float32),
        ),
        grid=(n_steps,),
        in_specs=[
            pl.BlockSpec((bb, C, HW), lambda i: (i, 0, 0)),
            pl.BlockSpec((K, 80), lambda i: (0, 0)),
        ],
        out_specs=(
            pl.BlockSpec((bb, K, HW), lambda i: (i, 0, 0)),
            pl.BlockSpec((bb, K, 128), lambda i: (i, 0, 0)),
        ),
        scratch_shapes=[pltpu.VMEM((8, HW + 2 * PAD), jnp.float32)],
        compiler_params=pltpu.CompilerParams(
            dimension_semantics=(("parallel",) if n_steps > 1 else ("arbitrary",))),
    )(x_flat, w_flat)

    softmax_nchw = sm_flat.reshape(B, K, H, W)           # free reshape
    centers = ctr_pad[:, :, :C]                          # drop lane padding
    return softmax_nchw, centers


def feature_centers_forward(x_nchw, weight, bias):
    """Mirrors the PyTorch module: ([per-class (B, C, 1, 1) centers], softmax)."""
    softmax_output, centers = feature_centers_core(
        x_nchw, weight, bias, tc_per_chip=_tensorcores_per_chip())
    B, C = x_nchw.shape[0], x_nchw.shape[1]
    K = softmax_output.shape[1]
    feature_centers = [centers[:, i, :].reshape(B, C, 1, 1) for i in range(1, K)]
    return feature_centers, softmax_output


def _reference(x_nchw, weight, bias):
    """Pure-JAX reference matching the PyTorch forward (full f32 precision)."""
    conv = jax.lax.conv_general_dilated(
        x_nchw.astype(jnp.float32), weight.astype(jnp.float32),
        window_strides=(1, 1), padding=((1, 1), (1, 1)),
        dimension_numbers=("NCHW", "OIHW", "NCHW"),
        precision=lax.Precision.HIGHEST)
    conv = conv + bias.reshape(1, -1, 1, 1)
    sm = jax.nn.softmax(conv, axis=1)
    K = sm.shape[1]
    centers = [
        jnp.mean(sm[:, i:i + 1, :, :] * x_nchw, axis=(2, 3), keepdims=True)
        for i in range(1, K)
    ]
    return centers, sm


if __name__ == "__main__":
    B, C, H, W = 2, 4, 16, 16
    n_classes = 3

    key = jax.random.PRNGKey(0)
    k_x, k_w, k_b = jax.random.split(key, 3)
    x = jax.random.normal(k_x, (B, C, H, W), dtype=jnp.float32)
    # Deterministic synthetic Conv2d(C -> n_classes, 3x3) parameters.
    weight = 0.1 * jax.random.normal(k_w, (n_classes, C, 3, 3), dtype=jnp.float32)
    bias = 0.1 * jax.random.normal(k_b, (n_classes,), dtype=jnp.float32)

    centers, softmax_out = feature_centers_forward(x, weight, bias)
    softmax_out = jax.block_until_ready(softmax_out)
    centers = [jax.block_until_ready(c) for c in centers]

    ref_centers, ref_softmax = _reference(x, weight, bias)
    assert softmax_out.shape == (B, n_classes, H, W)
    assert len(centers) == n_classes - 1 and centers[0].shape == (B, C, 1, 1)
    assert jnp.allclose(softmax_out, ref_softmax, atol=1e-5, rtol=1e-5)
    for c, rc in zip(centers, ref_centers):
        assert jnp.allclose(c, rc, atol=1e-5, rtol=1e-5)

    print("KERNEL_OK")
</pallas_src>

<mosaic_0001>
module attributes {stable_mosaic.version = 11 : i64} {
  func.func @_feature_centers_kernel(%arg0: i32, %arg1: memref<2x4x256xf32, #tpu.memory_space<vmem>>, %arg2: memref<3x80xf32, #tpu.memory_space<vmem>>, %arg3: memref<2x3x256xf32, #tpu.memory_space<vmem>>, %arg4: memref<2x3x128xf32, #tpu.memory_space<vmem>>, %arg5: memref<8x512xf32, #tpu.memory_space<vmem>>) attributes {dimension_semantics = [#tpu.dimension_semantics<arbitrary>], iteration_bounds = array<i64: 1>, scalar_prefetch = 0 : i64, scratch_operands = 1 : i64, tpu.core_type = #tpu.core_type<tc>, window_params = [{transform_indices = @transform_0, window_bounds = array<i64: 2, 4, 256>}, {pipeline_mode = #tpu.pipeline_mode<synchronous>, transform_indices = @transform_1, window_bounds = array<i64: 3, 80>}, {transform_indices = @transform_2, window_bounds = array<i64: 2, 3, 256>}, {transform_indices = @transform_3, window_bounds = array<i64: 2, 3, 128>}]} {
    %c0 = arith.constant 0 : index
    %c0_0 = arith.constant 0 : index
    %0 = vector.load %arg2[%c0, %c0_0] : memref<3x80xf32, #tpu.memory_space<vmem>>, vector<3x80xf32>
    %1 = tpu.iota {dimensions = array<i32: 1>} : vector<8x256xi32>
    %c16_i32 = arith.constant 16 : i32
    %c0_i32 = arith.constant 0 : i32
    %2 = arith.cmpi eq, %c16_i32, %c0_i32 : i32
    %c1_i32 = arith.constant 1 : i32
    %3 = arith.select %2, %c1_i32, %c16_i32 : i32
    %4 = vector.broadcast %3 : i32 to vector<8x256xi32>
    %5 = arith.remsi %1, %4 : vector<8x256xi32>
    %c0_i32_1 = arith.constant 0 : i32
    %6 = vector.broadcast %c0_i32_1 : i32 to vector<8x256xi32>
    %7 = arith.cmpi ne, %5, %6 : vector<8x256xi32>
    %c0_i32_2 = arith.constant 0 : i32
    %8 = vector.broadcast %c0_i32_2 : i32 to vector<8x256xi32>
    %9 = arith.cmpi slt, %5, %8 : vector<8x256xi32>
    %c0_i32_3 = arith.constant 0 : i32
    %10 = arith.cmpi slt, %3, %c0_i32_3 : i32
    %11 = vector.broadcast %10 : i1 to vector<8x256xi1>
    %12 = vector.broadcast %11 : vector<8x256xi1> to vector<8x256xi1>
    %13 = arith.xori %9, %12 : vector<8x256xi1>
    %14 = arith.andi %13, %7 : vector<8x256xi1>
    %15 = vector.broadcast %3 : i32 to vector<8x256xi32>
    %16 = arith.addi %5, %15 : vector<8x256xi32>
    %17 = arith.select %14, %16, %5 : vector<8x256xi1>, vector<8x256xi32>
    %c1_i32_4 = arith.constant 1 : i32
    %18 = vector.broadcast %c1_i32_4 : i32 to vector<8x256xi32>
    %19 = arith.cmpi sge, %17, %18 : vector<8x256xi32>
    %c14_i32 = arith.constant 14 : i32
    %20 = vector.broadcast %c14_i32 : i32 to vector<8x256xi32>
    %21 = arith.cmpi sle, %17, %20 : vector<8x256xi32>
    %22 = tpu.iota {dimensions = array<i32: 0>} : vector<8x256xi32>
    %c0_i32_5 = arith.constant 0 : i32
    %23 = vector.broadcast %c0_i32_5 : i32 to vector<8x256xi32>
    %24 = arith.cmpi eq, %22, %23 : vector<8x256xi32>
    %25 = arith.extui %24 : vector<8x256xi1> to vector<8x256xi32>
    %26 = arith.sitofp %25 : vector<8x256xi32> to vector<8x256xf32>
    %cst = arith.constant 0.000000e+00 : f32
    %27 = vector.broadcast %cst : f32 to vector<8x512xf32>
    %c0_6 = arith.constant 0 : index
    %c0_7 = arith.constant 0 : index
    %28 = vector.load %arg5[%c0_6, %c0_7] : memref<8x512xf32, #tpu.memory_space<vmem>>, vector<8x512xf32>
    tpu.vector_store %arg5[%c0_6, %c0_7], %27 {strides = array<i32>} : memref<8x512xf32, #tpu.memory_space<vmem>>, vector<8x512xf32>,
    %c0_8 = arith.constant 0 : index
    %c0_9 = arith.constant 0 : index
    %c0_10 = arith.constant 0 : index
    %29 = vector.load %arg1[%c0_8, %c0_9, %c0_10] : memref<2x4x256xf32, #tpu.memory_space<vmem>>, vector<1x4x256xf32>
    %30 = vector.shape_cast %29 : vector<1x4x256xf32> to vector<4x256xf32>
    %c0_11 = arith.constant 0 : index
    %c128 = arith.constant 128 : index
    %31 = vector.load %arg5[%c0_11, %c128] : memref<8x512xf32, #tpu.memory_space<vmem>>, vector<4x256xf32>
    tpu.vector_store %arg5[%c0_11, %c128], %30 {strides = array<i32>} : memref<8x512xf32, #tpu.memory_space<vmem>>, vector<4x256xf32>,
    %c0_12 = arith.constant 0 : index
    %c0_13 = arith.constant 0 : index
    %32 = vector.load %arg5[%c0_12, %c0_13] : memref<8x512xf32, #tpu.memory_space<vmem>>, vector<8x512xf32>
    %33 = vector.extract_strided_slice %32 {offsets = [0, 111], sizes = [8, 256], strides = [1, 1]} : vector<8x512xf32> to vector<8x256xf32>
    %cst_14 = arith.constant 0.000000e+00 : f32
    %34 = vector.broadcast %cst_14 : f32 to vector<8x256xf32>
    %35 = arith.select %19, %33, %34 : vector<8x256xi1>, vector<8x256xf32>
    %36 = vector.extract_strided_slice %32 {offsets = [0, 112], sizes = [8, 256], strides = [1, 1]} : vector<8x512xf32> to vector<8x256xf32>
    %37 = vector.extract_strided_slice %32 {offsets = [0, 113], sizes = [8, 256], strides = [1, 1]} : vector<8x512xf32> to vector<8x256xf32>
    %cst_15 = arith.constant 0.000000e+00 : f32
    %38 = vector.broadcast %cst_15 : f32 to vector<8x256xf32>
    %39 = arith.select %21, %37, %38 : vector<8x256xi1>, vector<8x256xf32>
    %40 = vector.extract_strided_slice %32 {offsets = [0, 127], sizes = [8, 256], strides = [1, 1]} : vector<8x512xf32> to vector<8x256xf32>
    %cst_16 = arith.constant 0.000000e+00 : f32
    %41 = vector.broadcast %cst_16 : f32 to vector<8x256xf32>
    %42 = arith.select %19, %40, %41 : vector<8x256xi1>, vector<8x256xf32>
    %43 = vector.extract_strided_slice %32 {offsets = [0, 128], sizes = [8, 256], strides = [1, 1]} : vector<8x512xf32> to vector<8x256xf32>
    %44 = vector.extract_strided_slice %32 {offsets = [0, 129], sizes = [8, 256], strides = [1, 1]} : vector<8x512xf32> to vector<8x256xf32>
    %cst_17 = arith.constant 0.000000e+00 : f32
    %45 = vector.broadcast %cst_17 : f32 to vector<8x256xf32>
    %46 = arith.select %21, %44, %45 : vector<8x256xi1>, vector<8x256xf32>
    %47 = vector.extract_strided_slice %32 {offsets = [0, 143], sizes = [8, 256], strides = [1, 1]} : vector<8x512xf32> to vector<8x256xf32>
    %cst_18 = arith.constant 0.000000e+00 : f32
    %48 = vector.broadcast %cst_18 : f32 to vector<8x256xf32>
    %49 = arith.select %19, %47, %48 : vector<8x256xi1>, vector<8x256xf32>
    %50 = vector.extract_strided_slice %32 {offsets = [0, 144], sizes = [8, 256], strides = [1, 1]} : vector<8x512xf32> to vector<8x256xf32>
    %51 = vector.extract_strided_slice %32 {offsets = [0, 145], sizes = [8, 256], strides = [1, 1]} : vector<8x512xf32> to vector<8x256xf32>
    %cst_19 = arith.constant 0.000000e+00 : f32
    %52 = vector.broadcast %cst_19 : f32 to vector<8x256xf32>
    %53 = arith.select %21, %51, %52 : vector<8x256xi1>, vector<8x256xf32>
    %54 = tpu.concatenate %35, %36, %39, %42, %43, %46, %49, %50, %53, %26 in 0 : vector<8x256xf32>, vector<8x256xf32>, vector<8x256xf32>, vector<8x256xf32>, vector<8x256xf32>, vector<8x256xf32>, vector<8x256xf32>, vector<8x256xf32>, vector<8x256xf32>, vector<8x256xf32> -> vector<80x256xf32>
    %cst_20 = arith.constant dense<0.000000e+00> : vector<3x256xf32>
    %55 = tpu.matmul %0, %54, %cst_20 {dimension_numbers = #tpu.dot_dimension_numbers<[1], [0], [0], [1], [0, 0, 1, 1], [], []>, precision = #tpu.contract_precision<fp32>} : vector<3x80xf32>, vector<80x256xf32>, vector<3x256xf32> -> vector<3x256xf32>
    %cst_21 = arith.constant dense<0xFF800000> : vector<256xf32>
    %56 = vector.multi_reduction <maximumf>, %55, %cst_21 [0] : vector<3x256xf32> to vector<256xf32>
    %57 = vector.shape_cast %56 : vector<256xf32> to vector<1x256xf32>
    %58 = vector.broadcast %57 : vector<1x256xf32> to vector<3x256xf32>
    %59 = arith.subf %55, %58 : vector<3x256xf32>
    %60 = math.exp %59 : vector<3x256xf32>
    %cst_22 = arith.constant dense<0.000000e+00> : vector<256xf32>
    %61 = vector.multi_reduction <add>, %60, %cst_22 [0] : vector<3x256xf32> to vector<256xf32>
    %62 = vector.shape_cast %61 : vector<256xf32> to vector<1x256xf32>
    %63 = tpu.reciprocal %62 : vector<1x256xf32> -> vector<1x256xf32>
    %64 = vector.broadcast %63 : vector<1x256xf32> to vector<3x256xf32>
    %65 = arith.mulf %60, %64 : vector<3x256xf32>
    %c0_23 = arith.constant 0 : index
    %c0_24 = arith.constant 0 : index
    %c0_25 = arith.constant 0 : index
    %66 = vector.load %arg3[%c0_23, %c0_24, %c0_25] : memref<2x3x256xf32, #tpu.memory_space<vmem>>, vector<1x3x256xf32>
    %67 = vector.shape_cast %66 : vector<1x3x256xf32> to vector<3x256xf32>
    %68 = vector.shape_cast %65 : vector<3x256xf32> to vector<1x3x256xf32>
    tpu.vector_store %arg3[%c0_23, %c0_24, %c0_25], %68 {strides = array<i32>} : memref<2x3x256xf32, #tpu.memory_space<vmem>>, vector<1x3x256xf32>,
    %69 = vector.extract_strided_slice %32 {offsets = [0, 128], sizes = [8, 256], strides = [1, 1]} : vector<8x512xf32> to vector<8x256xf32>
    %cst_26 = arith.constant dense<0.000000e+00> : vector<3x8xf32>
    %70 = tpu.matmul %65, %69, %cst_26 {dimension_numbers = #tpu.dot_dimension_numbers<[1], [1], [0], [0], [0, 0, 1, 0], [], []>, precision = #tpu.contract_precision<fp32>} : vector<3x256xf32>, vector<8x256xf32>, vector<3x8xf32> -> vector<3x8xf32>
    %cst_27 = arith.constant 3.906250e-03 : f32
    %71 = vector.broadcast %cst_27 : f32 to vector<3x8xf32>
    %72 = arith.mulf %70, %71 : vector<3x8xf32>
    %cst_28 = arith.constant 0.000000e+00 : f32
    %73 = vector.broadcast %cst_28 : f32 to vector<3x120xf32>
    %74 = tpu.concatenate %72, %73 in 1 : vector<3x8xf32>, vector<3x120xf32> -> vector<3x128xf32>
    %c0_29 = arith.constant 0 : index
    %c0_30 = arith.constant 0 : index
    %c0_31 = arith.constant 0 : index
    %75 = vector.load %arg4[%c0_29, %c0_30, %c0_31] : memref<2x3x128xf32, #tpu.memory_space<vmem>>, vector<1x3x128xf32>
    %76 = vector.shape_cast %75 : vector<1x3x128xf32> to vector<3x128xf32>
    %77 = vector.shape_cast %74 : vector<3x128xf32> to vector<1x3x128xf32>
    tpu.vector_store %arg4[%c0_29, %c0_30, %c0_31], %77 {strides = array<i32>} : memref<2x3x128xf32, #tpu.memory_space<vmem>>, vector<1x3x128xf32>,
    %c1 = arith.constant 1 : index
    %c0_32 = arith.constant 0 : index
    %c0_33 = arith.constant 0 : index
    %78 = vector.load %arg1[%c1, %c0_32, %c0_33] : memref<2x4x256xf32, #tpu.memory_space<vmem>>, vector<1x4x256xf32>
    %79 = vector.shape_cast %78 : vector<1x4x256xf32> to vector<4x256xf32>
    %c0_34 = arith.constant 0 : index
    %c128_35 = arith.constant 128 : index
    %80 = vector.load %arg5[%c0_34, %c128_35] : memref<8x512xf32, #tpu.memory_space<vmem>>, vector<4x256xf32>
    tpu.vector_store %arg5[%c0_34, %c128_35], %79 {strides = array<i32>} : memref<8x512xf32, #tpu.memory_space<vmem>>, vector<4x256xf32>,
    %c0_36 = arith.constant 0 : index
    %c0_37 = arith.constant 0 : index
    %81 = vector.load %arg5[%c0_36, %c0_37] : memref<8x512xf32, #tpu.memory_space<vmem>>, vector<8x512xf32>
    %82 = vector.extract_strided_slice %81 {offsets = [0, 111], sizes = [8, 256], strides = [1, 1]} : vector<8x512xf32> to vector<8x256xf32>
    %cst_38 = arith.constant 0.000000e+00 : f32
    %83 = vector.broadcast %cst_38 : f32 to vector<8x256xf32>
    %84 = arith.select %19, %82, %83 : vector<8x256xi1>, vector<8x256xf32>
    %85 = vector.extract_strided_slice %81 {offsets = [0, 112], sizes = [8, 256], strides = [1, 1]} : vector<8x512xf32> to vector<8x256xf32>
    %86 = vector.extract_strided_slice %81 {offsets = [0, 113], sizes = [8, 256], strides = [1, 1]} : vector<8x512xf32> to vector<8x256xf32>
    %cst_39 = arith.constant 0.000000e+00 : f32
    %87 = vector.broadcast %cst_39 : f32 to vector<8x256xf32>
    %88 = arith.select %21, %86, %87 : vector<8x256xi1>, vector<8x256xf32>
    %89 = vector.extract_strided_slice %81 {offsets = [0, 127], sizes = [8, 256], strides = [1, 1]} : vector<8x512xf32> to vector<8x256xf32>
    %cst_40 = arith.constant 0.000000e+00 : f32
    %90 = vector.broadcast %cst_40 : f32 to vector<8x256xf32>
    %91 = arith.select %19, %89, %90 : vector<8x256xi1>, vector<8x256xf32>
    %92 = vector.extract_strided_slice %81 {offsets = [0, 128], sizes = [8, 256], strides = [1, 1]} : vector<8x512xf32> to vector<8x256xf32>
    %93 = vector.extract_strided_slice %81 {offsets = [0, 129], sizes = [8, 256], strides = [1, 1]} : vector<8x512xf32> to vector<8x256xf32>
    %cst_41 = arith.constant 0.000000e+00 : f32
    %94 = vector.broadcast %cst_41 : f32 to vector<8x256xf32>
    %95 = arith.select %21, %93, %94 : vector<8x256xi1>, vector<8x256xf32>
    %96 = vector.extract_strided_slice %81 {offsets = [0, 143], sizes = [8, 256], strides = [1, 1]} : vector<8x512xf32> to vector<8x256xf32>
    %cst_42 = arith.constant 0.000000e+00 : f32
    %97 = vector.broadcast %cst_42 : f32 to vector<8x256xf32>
    %98 = arith.select %19, %96, %97 : vector<8x256xi1>, vector<8x256xf32>
    %99 = vector.extract_strided_slice %81 {offsets = [0, 144], sizes = [8, 256], strides = [1, 1]} : vector<8x512xf32> to vector<8x256xf32>
    %100 = vector.extract_strided_slice %81 {offsets = [0, 145], sizes = [8, 256], strides = [1, 1]} : vector<8x512xf32> to vector<8x256xf32>
    %cst_43 = arith.constant 0.000000e+00 : f32
    %101 = vector.broadcast %cst_43 : f32 to vector<8x256xf32>
    %102 = arith.select %21, %100, %101 : vector<8x256xi1>, vector<8x256xf32>
    %103 = tpu.concatenate %84, %85, %88, %91, %92, %95, %98, %99, %102, %26 in 0 : vector<8x256xf32>, vector<8x256xf32>, vector<8x256xf32>, vector<8x256xf32>, vector<8x256xf32>, vector<8x256xf32>, vector<8x256xf32>, vector<8x256xf32>, vector<8x256xf32>, vector<8x256xf32> -> vector<80x256xf32>
    %cst_44 = arith.constant dense<0.000000e+00> : vector<3x256xf32>
    %104 = tpu.matmul %0, %103, %cst_44 {dimension_numbers = #tpu.dot_dimension_numbers<[1], [0], [0], [1], [0, 0, 1, 1], [], []>, precision = #tpu.contract_precision<fp32>} : vector<3x80xf32>, vector<80x256xf32>, vector<3x256xf32> -> vector<3x256xf32>
    %cst_45 = arith.constant dense<0xFF800000> : vector<256xf32>
    %105 = vector.multi_reduction <maximumf>, %104, %cst_45 [0] : vector<3x256xf32> to vector<256xf32>
    %106 = vector.shape_cast %105 : vector<256xf32> to vector<1x256xf32>
    %107 = vector.broadcast %106 : vector<1x256xf32> to vector<3x256xf32>
    %108 = arith.subf %104, %107 : vector<3x256xf32>
    %109 = math.exp %108 : vector<3x256xf32>
    %cst_46 = arith.constant dense<0.000000e+00> : vector<256xf32>
    %110 = vector.multi_reduction <add>, %109, %cst_46 [0] : vector<3x256xf32> to vector<256xf32>
    %111 = vector.shape_cast %110 : vector<256xf32> to vector<1x256xf32>
    %112 = tpu.reciprocal %111 : vector<1x256xf32> -> vector<1x256xf32>
    %113 = vector.broadcast %112 : vector<1x256xf32> to vector<3x256xf32>
    %114 = arith.mulf %109, %113 : vector<3x256xf32>
    %c1_47 = arith.constant 1 : index
    %c0_48 = arith.constant 0 : index
    %c0_49 = arith.constant 0 : index
    %115 = vector.load %arg3[%c1_47, %c0_48, %c0_49] : memref<2x3x256xf32, #tpu.memory_space<vmem>>, vector<1x3x256xf32>
    %116 = vector.shape_cast %115 : vector<1x3x256xf32> to vector<3x256xf32>
    %117 = vector.shape_cast %114 : vector<3x256xf32> to vector<1x3x256xf32>
    tpu.vector_store %arg3[%c1_47, %c0_48, %c0_49], %117 {strides = array<i32>} : memref<2x3x256xf32, #tpu.memory_space<vmem>>, vector<1x3x256xf32>,
    %118 = vector.extract_strided_slice %81 {offsets = [0, 128], sizes = [8, 256], strides = [1, 1]} : vector<8x512xf32> to vector<8x256xf32>
    %cst_50 = arith.constant dense<0.000000e+00> : vector<3x8xf32>
    %119 = tpu.matmul %114, %118, %cst_50 {dimension_numbers = #tpu.dot_dimension_numbers<[1], [1], [0], [0], [0, 0, 1, 0], [], []>, precision = #tpu.contract_precision<fp32>} : vector<3x256xf32>, vector<8x256xf32>, vector<3x8xf32> -> vector<3x8xf32>
    %cst_51 = arith.constant 3.906250e-03 : f32
    %120 = vector.broadcast %cst_51 : f32 to vector<3x8xf32>
    %121 = arith.mulf %119, %120 : vector<3x8xf32>
    %cst_52 = arith.constant 0.000000e+00 : f32
    %122 = vector.broadcast %cst_52 : f32 to vector<3x120xf32>
    %123 = tpu.concatenate %121, %122 in 1 : vector<3x8xf32>, vector<3x120xf32> -> vector<3x128xf32>
    %c1_53 = arith.constant 1 : index
    %c0_54 = arith.constant 0 : index
    %c0_55 = arith.constant 0 : index
    %124 = vector.load %arg4[%c1_53, %c0_54, %c0_55] : memref<2x3x128xf32, #tpu.memory_space<vmem>>, vector<1x3x128xf32>
    %125 = vector.shape_cast %124 : vector<1x3x128xf32> to vector<3x128xf32>
    %126 = vector.shape_cast %123 : vector<3x128xf32> to vector<1x3x128xf32>
    tpu.vector_store %arg4[%c1_53, %c0_54, %c0_55], %126 {strides = array<i32>} : memref<2x3x128xf32, #tpu.memory_space<vmem>>, vector<1x3x128xf32>,
    return
  }
  func.func @transform_0(%arg0: i32) -> (i32, i32, i32) {
    %c0_i32 = arith.constant 0 : i32
    %c0_i32_0 = arith.constant 0 : i32
    %c0_i32_1 = arith.constant 0 : i32
    return %arg0, %c0_i32, %c0_i32_0 : i32, i32, i32
  }
  func.func @transform_1(%arg0: i32) -> (i32, i32) {
    %c0_i32 = arith.constant 0 : i32
    %c0_i32_0 = arith.constant 0 : i32
    %c0_i32_1 = arith.constant 0 : i32
    return %c0_i32, %c0_i32_0 : i32, i32
  }
  func.func @transform_2(%arg0: i32) -> (i32, i32, i32) {
    %c0_i32 = arith.constant 0 : i32
    %c0_i32_0 = arith.constant 0 : i32
    %c0_i32_1 = arith.constant 0 : i32
    return %arg0, %c0_i32, %c0_i32_0 : i32, i32, i32
  }
  func.func @transform_3(%arg0: i32) -> (i32, i32, i32) {
    %c0_i32 = arith.constant 0 : i32
    %c0_i32_0 = arith.constant 0 : i32
    %c0_i32_1 = arith.constant 0 : i32
    return %arg0, %c0_i32, %c0_i32_0 : i32, i32, i32
  }
}

</mosaic_0001>

<bundles_post_ra>
// kernel: feature_centers_core.1
= control target key start
LH: loop header
LB: loop body
LE: loop exit
PB: predicated region body
PF: predicated region fallthrough
CT: control target
= control target key end

     0   :  { %v4042_v0 = vmov 0.0   ;;  %s3064_s12 = smov 17   ;;  %s3065_s15 = smov 16   ;;  %v14_v11 = vlaneseq  ;;  %vm73_vm0 = vcmask 138240   ;;  %vm152_vm1 = vcmask 130048   ;;  %s4034_s0 = inlined_call_operand.vmem [shape: f32[2,4,256], index: 0, kind: input, shape index: {}]   ;;  %s4035_s1 = inlined_call_operand.vmem [shape: f32[3,80], index: 1, kind: input, shape index: {}]   ;;  %s4036_s2 = inlined_call_operand.vmem [shape: f32[2,3,256], index: 2, kind: output, shape index: {0}]   ;;  %s4037_s3 = inlined_call_operand.vmem [shape: f32[2,3,128], index: 3, kind: output, shape index: {1}]  }
   0x1   :  { %50 = vst [vmem:[#allocation2] sm:$0xff] %v4042_v0  ;;  %67 = vrot.lane.b32.xlu1 %v4042_v0, %s3064_s12  ;;  %51 = vst [vmem:[#allocation2 + $0x8] sm:$0xff] %v4042_v0  ;;  %v54_v1 = vld [vmem:[%s4034_s0] sm:$0xff]  ;;  %256 = vmatprep.mubr.f32.mxu0 %v4042_v0  ;;  %s3066_s16 = smov 15   ;;  %s3067_s17 = smov 1   ;;  %v4099_v16 = vmov 0 }
   0x2   :  { %52 = vst [vmem:[#allocation2 + $0x10] sm:$0xff] %v4042_v0  ;;  %58 = vst [vmem:[#allocation2 + $0x8] sm:$0xf] %v54_v1  ;;  %v56_v2 = vcombine.high %v54_v1, %v54_v1  ;;  %s3068_s18 = smov 127   ;;  %s3069_s19 = smov 113   ;;  %v15_v13 = vand.u32 127, %v14_v11 }
   0x3   :  { %s3070_s20 = smov 112   ;;  %s3071_s21 = smov 111   ;;  %v4102_v32 = vmov 0  ;;  %vm86_vm4 = vcmask 121856   ;;  %v4105_v38 = vmov 0  ;;  %vm99_vm6 = vcmask 7168  }
   0x4   :  { %59 = vst [vmem:[#allocation2 + $0x10] sm:$0xf] %v56_v2  ;;  %v21_v14 = vand.u32 15, %v15_v13  ;;  %v16_v21 = vadd.s32 128, %v15_v13  ;;  %v4108_v60 = vmov 0  ;;  %vm113_vm8 = vcmask 1039360  }
   0x5   :  { %146 = vrot.lane.b32.xlu1 %v4042_v0, %s3065_s15  ;;  %vm168_vm9 = vcmask 654336   ;;  %vm126_vm10 = vcmask 924672   ;;  %vm163_vm11 = vcmask 916480   ;;  %vm139_vm13 = vcmask 908288  }
   0x6   :  { %vm3162_vm2 = vcmp.ge.s32.totalorder %v21_v14, 1  ;;  %v28_v29 = vand.u32 15, %v16_v21  ;;  %vm3215_vm7 = vcmp.le.s32.totalorder %v21_v14, 14  ;;  %vm3072_vm14 = vmmov 1  }
   0x7   :  { %v4100_v16 = vsel %vm3162_vm2, 4294967295, %v4099_v16  ;;  %v4109_v60 = vsel %vm3215_vm7, 4294967295, %v4108_v60 }
   0x8   :  { %4101 = vst [vmem:[#allocation5_spill] sm:$0xff] %v4100_v16  ;;  %vm3176_vm3 = vcmp.ge.s32.totalorder %v28_v29, 1  ;;  %vm3189_vm5 = vcmp.le.s32.totalorder %v28_v29, 14  ;;  %4110 = vst [vmem:[#allocation8_spill] sm:$0xff] %v4109_v60 }
   0x9   :  { %v3105_v3 = vld [vmem:[#allocation2 + $0x8] sm:$0xff]  ;;  %v4103_v32 = vsel %vm3176_vm3, 4294967295, %v4102_v32  ;;  %v4106_v38 = vsel %vm3189_vm5, 4294967295, %v4105_v38 }
   0xa   :  { %69 = vrot.lane.b32.xlu0 %v3105_v3, %s3064_s12  ;;  %148 = vrot.lane.b32.xlu1 %v3105_v3, %s3065_s15  ;;  %v3130_v7 = vand.u32 4294901760, %v3105_v3  ;;  %4104 = vst [vmem:[#allocation6_spill] sm:$0xff] %v4103_v32  ;;  %4107 = vst [vmem:[#allocation7_spill] sm:$0xff] %v4106_v38 }
   0xb   :  { %v62_v4 = vld [vmem:[#allocation2 + $0x10] sm:$0xff] }
   0xc   :  { %v3119_v5 = vand.u32 4294901760, %v62_v4  ;;  %4098 = vst [vmem:[#allocation4_spill] sm:$0xff] %v3130_v7 }
   0xe   :  { %82 = vrot.lane.b32.xlu0 %v3105_v3, %s3066_s16  ;;  %84 = vrot.lane.b32.xlu1 %v62_v4, %s3066_s16  ;;  %4097 = vst [vmem:[#allocation3_spill] sm:$0xff] %v3119_v5  ;;  %v3127_v6 = vsub.f32 %v62_v4, %v3119_v5 }
   0xf   :  { %916 = vmatprep.subr.mxu1 %v3119_v5 }
  0x10   :  { %v3133_v8 = vand.u32 4294901760, %v3127_v6  ;;  %918 = vmatpush1.xpose.msra.mxu1 %v3130_v7 }
  0x12   :  { %71 = vrot.lane.b32.xlu0 %v62_v4, %s3064_s12  ;;  %97 = vrot.lane.b32.xlu1 %v62_v4, %s3067_s17  ;;  %v319_v9 = vsub.f32 %v3127_v6, %v3133_v8 }
  0x14   :  { %v3141_v10 = vand.u32 4294901760, %v319_v9 }
  0x16   :  { %150 = vrot.lane.b32.xlu0 %v62_v4, %s3065_s15  ;;  %93 = vrot.lane.b32.xlu1 %v4042_v0, %s3067_s17 }
  0x17   :  { %1002 = vmatprep.subr.mxu1 %v3141_v10 }
  0x1a   :  { %95 = vrot.lane.b32.xlu0 %v3105_v3, %s3067_s17  ;;  %111 = vrot.lane.b32.xlu1 %v4042_v0, %s3068_s18 }
  0x1e   :  { %80 = vrot.lane.b32.xlu0 %v4042_v0, %s3066_s16  ;;  %122 = vrot.lane.b32.xlu1 %v62_v4, %s3069_s19 }
  0x22   :  { %109 = vrot.lane.b32.xlu0 %v62_v4, %s3068_s18  ;;  %120 = vrot.lane.b32.xlu1 %v3105_v3, %s3069_s19 }
  0x26   :  { %107 = vrot.lane.b32.xlu0 %v3105_v3, %s3068_s18  ;;  %161 = vrot.lane.b32.xlu1 %v4042_v0, %s3070_s20 }
  0x2a   :  { %124 = vrot.lane.b32.xlu0 %v4042_v0, %s3069_s19  ;;  %135 = vrot.lane.b32.xlu1 %v62_v4, %s3071_s21 }
  0x2e   :  { %159 = vrot.lane.b32.xlu0 %v62_v4, %s3070_s20  ;;  %133 = vrot.lane.b32.xlu1 %v3105_v3, %s3071_s21 }
  0x32   :  { %157 = vrot.lane.b32.xlu0 %v3105_v3, %s3070_s20 }
  0x36   :  { %137 = vrot.lane.b32.xlu0 %v4042_v0, %s3071_s21 }
  0x73   :  { %v68_v12 = vpop.permute.xlu1 %67 }
  0x77   :  { %v147_v15 = vpop.permute.xlu1 %146 }
  0x7c   :  { %v70_v17 = vpop.permute.xlu0 %69  ;;  %v149_v18 = vpop.permute.xlu1 %148 }
  0x7d   :  { %v74_v19 = vsel %vm73_vm0, %v68_v12, %v70_v17  ;;  %v153_v20 = vsel %vm152_vm1, %v147_v15, %v149_v18 }
  0x7e   :  { %v78_v22 = vsel %vm3162_vm2, %v74_v19, 0.0  ;;  %v178_v23 = vand.u32 4294901760, %v153_v20 }
  0x7f   :  { %v174_v24 = vand.u32 4294901760, %v78_v22 }
  0x80   :  { %v83_v25 = vpop.permute.xlu0 %82  ;;  %v3170_v26 = vsub.f32 %v153_v20, %v178_v23  ;;  %v85_v27 = vpop.permute.xlu1 %84 }
  0x81   :  { %v3172_v28 = vsub.f32 %v78_v22, %v174_v24  ;;  %v88_v39 = vsel %vm86_vm4, %v83_v25, %v85_v27  ;;  %v3205_v54 = vpack.c.bf16 %v178_v23, %v174_v24  ;;  %v13_v24 = vld [vmem:[%s4035_s1] sm:$0x7] }
  0x82   :  { %v288_v30 = vand.u32 4294901760, %v3170_v26  ;;  %v92_v43 = vsel %vm3189_vm5, %v88_v39, 0.0 }
  0x83   :  { %v276_v31 = vand.u32 4294901760, %v3172_v28  ;;  %v180_v47 = vand.u32 4294901760, %v92_v43 }
  0x84   :  { %v72_v33 = vpop.permute.xlu0 %71  ;;  %v98_v34 = vpop.permute.xlu1 %97 }
  0x85   :  { %v75_v35 = vsel %vm73_vm0, %v70_v17, %v72_v33  ;;  %v3185_v36 = vpack.c.bf16 %v288_v30, %v276_v31  ;;  %v3219_v61 = vsub.f32 %v92_v43, %v180_v47 }
  0x86   :  { %v79_v37 = vsel %vm3176_vm3, %v75_v35, 0.0 }
  0x87   :  { %v172_v40 = vand.u32 4294901760, %v79_v37  ;;  %v294_v17 = vand.u32 4294901760, %v3219_v61 }
  0x88   :  { %v151_v41 = vpop.permute.xlu0 %150  ;;  %v94_v42 = vpop.permute.xlu1 %93 }
  0x89   :  { %v154_v44 = vsel %vm152_vm1, %v149_v18, %v151_v41  ;;  %v3197_v45 = vsub.f32 %v79_v37, %v172_v40 }
  0x8a   :  { %v176_v46 = vand.u32 4294901760, %v154_v44 }
  0x8b   :  { %v270_v55 = vand.u32 4294901760, %v3197_v45 }
  0x8c   :  { %v3199_v48 = vsub.f32 %v154_v44, %v176_v46  ;;  %v96_v49 = vpop.permute.xlu0 %95  ;;  %v3201_v50 = vpack.c.bf16 %v176_v46, %v172_v40  ;;  %v112_v51 = vpop.permute.xlu1 %111  ;;  %v170_v40 = vsel %vm168_vm9, %v13_v24, 0 }
  0x8d   :  { %v101_v52 = vsel %vm99_vm6, %v96_v49, %v98_v34  ;;  %v100_v53 = vsel %vm99_vm6, %v94_v42, %v96_v49  ;;  %v2732_v34 = vld [vmem:[%s4034_s0 + $0x8] sm:$0xff]  ;;  %v3274_v49 = vand.u32 4294901760, %v170_v40 }
  0x8e   :  { %v282_v56 = vand.u32 4294901760, %v3199_v48  ;;  %v105_v57 = vsel %vm3176_vm3, %v101_v52, 0.0  ;;  %2742 = vmatprep.subr.bf16.mxu0 %v3201_v50  ;;  %v104_v58 = vsel %vm3162_vm2, %v100_v53, 0.0  ;;  %v1394_v41 = vcombine.high %v2732_v34, %v2732_v34  ;;  %1396 = vst [vmem:[#allocation2 + $0x8] sm:$0xf] %v2732_v34 }
  0x8f   :  { %v184_v59 = vand.u32 4294901760, %v105_v57  ;;  %2744 = vmatpush1.bf16.msra.mxu0 %v3205_v54  ;;  %v186_v62 = vand.u32 4294901760, %v104_v58  ;;  %4111 = vst [vmem:[#allocation9_spill] sm:$0xff] %v3274_v49 }
  0x90   :  { %v81_v63 = vpop.permute.xlu0 %80  ;;  %v123_v1 = vpop.permute.xlu1 %122  ;;  %v3225_v2 = vpack.c.bf16 %v282_v56, %v270_v55  ;;  %1397 = vst [vmem:[#allocation2 + $0x10] sm:$0xf] %v1394_v41 }
  0x91   :  { %v3227_v4 = vsub.f32 %v105_v57, %v184_v59  ;;  %v87_v9 = vsel %vm86_vm4, %v81_v63, %v83_v25  ;;  %v3230_v12 = vpack.c.bf16 %v184_v59, %v180_v47  ;;  %v3237_v18 = vsub.f32 %v104_v58, %v186_v62 }
  0x92   :  { %v91_v13 = vsel %vm3215_vm7, %v87_v9, 0.0  ;;  %v46_v59 = vshrl.u32 %v14_v11, 7 }
  0x93   :  { %v306_v14 = vand.u32 4294901760, %v3227_v4  ;;  %v182_v15 = vand.u32 4294901760, %v91_v13  ;;  %2746 = vmatprep.subr.bf16.mxu0 %v3230_v12  ;;  %v4038_v35 = vand.u32 4294901760, %v3237_v18 }
  0x94   :  { %v110_v19 = vpop.permute.xlu0 %109  ;;  %v121_v20 = vpop.permute.xlu1 %120  ;;  %vm47_vm12 = vcmp.eq.s32.totalorder %v46_v59, 0 }
  0x95   :  { %v3239_v21 = vsub.f32 %v91_v13, %v182_v15  ;;  %v115_v22 = vsel %vm113_vm8, %v110_v19, %v112_v51  ;;  %v3242_v23 = vpack.c.bf16 %v186_v62, %v182_v15  ;;  %v3253_v27 = vpack.c.bf16 %v306_v14, %v294_v17  ;;  %vm3370_vm15 = vmpackc.low %vm47_vm12, %vm3072_vm14 }
  0x96   :  { %v119_v25 = vsel %vm3189_vm5, %v115_v22, 0.0  ;;  %v127_v51 = vsel %vm126_vm10, %v121_v20, %v123_v1  ;;  %v3288_v13 = vsub.f32 %v170_v40, %v3274_v49 }
  0x97   :  { %v4039_v29 = vand.u32 4294901760, %v3239_v21  ;;  %v192_v33 = vand.u32 4294901760, %v119_v25  ;;  %2748 = vmatpush1.bf16.msra.mxu0 %v3242_v23  ;;  %v131_v63 = vsel %vm3162_vm2, %v127_v51, 0.0 }
  0x98   :  { %v108_v37 = vpop.permute.xlu0 %107  ;;  %v162_v39 = vpop.permute.xlu1 %161  ;;  %4112 = vst [vmem:[#allocation10_spill] sm:$0xff] %v3288_v13  ;;  %v198_v20 = vand.u32 4294901760, %v131_v63 }
  0x99   :  { %v114_v42 = vsel %vm113_vm8, %v108_v37, %v110_v19  ;;  %v3263_v43 = vpack.c.bf16 %v192_v33, %v3119_v5  ;;  %v3271_v46 = vpack.c.bf16 %v4038_v35, %v4039_v29  ;;  %v3295_v19 = vld [vmem:[#allocation2 + $0x10] sm:$0xff]  ;;  %v3302_v37 = vand.u32 4294901760, %v3288_v13 }
  0x9a   :  { %v118_v44 = vsel %vm3215_vm7, %v114_v42, 0.0  ;;  %1409 = vrot.lane.b32.xlu1 %v3295_v19, %s3064_s12  ;;  %v4118_v5 = vand.u32 4294901760, %v3239_v21 }
  0x9b   :  { %v194_v47 = vand.u32 4294901760, %v118_v44  ;;  %2750 = vmatprep.subr.bf16.mxu0 %v3263_v43  ;;  %4113 = vst [vmem:[#allocation11_spill] sm:$0xff] %v3302_v37 }
  0x9c   :  { %v125_v52 = vpop.permute.xlu0 %124  ;;  %v136_v58 = vpop.permute.xlu1 %135  ;;  %v301_v60 = vsub.f32 %v3239_v21, %v4118_v5 }
  0x9d   :  { %v128_v53 = vsel %vm126_vm10, %v123_v1, %v125_v52  ;;  %v3279_v57 = vpack.c.bf16 %v194_v47, %v3130_v7  ;;  %v3290_v1 = vld [vmem:[#allocation2 + $0x8] sm:$0xff]  ;;  %v3315_v52 = vsub.f32 %v3105_v3, %v3130_v7  ;;  %v283_v3 = vsub.f32 %v3199_v48, %v282_v56 }
  0x9e   :  { %v132_v62 = vsel %vm3176_vm3, %v128_v53, 0.0  ;;  %1407 = vrot.lane.b32.xlu0 %v3290_v1, %s3064_s12  ;;  %v3317_v53 = vsub.f32 %v131_v63, %v198_v20  ;;  %1480 = vrot.lane.b32.xlu1 %v3290_v1, %s3065_s15  ;;  %v260_v63 = vsub.f32 %v3288_v13, %v3302_v37 }
  0x9f   :  { %v196_v9 = vand.u32 4294901760, %v132_v62  ;;  %2752 = vmatpush1.bf16.msra.mxu0 %v3279_v57 }
  0xa0   :  { %v160_v15 = vpop.permute.xlu0 %159  ;;  %v134_v34 = vpop.permute.xlu1 %133 }
  0xa1   :  { %v165_v11 = vsel %vm163_vm11, %v160_v15, %v162_v39  ;;  %v3299_v24 = vsub.f32 %v132_v62, %v196_v9  ;;  %v2725_v39 = vsel %vm47_vm12, 1.0, %v4042_v0 }
  0xa2   :  { %v200_v22 = vand.u32 4294901760, %v165_v11  ;;  %1405 = vrot.lane.b32.xlu0 %v4042_v0, %s3064_s12  ;;  %1478 = vrot.lane.b32.xlu1 %v4042_v0, %s3065_s15 }
  0xa4   :  { %v3304_v40 = vsub.f32 %v165_v11, %v200_v22  ;;  %v158_v41 = vpop.permute.xlu0 %157  ;;  %v3306_v42 = vpack.c.bf16 %v200_v22, %v196_v9  ;;  %v140_v9 = vsel %vm139_vm13, %v134_v34, %v136_v58  ;;  %v3324_v22 = vsub.f32 %v119_v25, %v192_v33 }
  0xa5   :  { %v164_v51 = vsel %vm163_vm11, %v158_v41, %v160_v15  ;;  %v4040_v15 = vand.u32 4294901760, %v3299_v24  ;;  %v277_v41 = vsub.f32 %v3172_v28, %v276_v31  ;;  %v289_v34 = vsub.f32 %v3170_v26, %v288_v30 }
  0xa6   :  { %v4041_v62 = vand.u32 4294901760, %v3304_v40  ;;  %v202_v11 = vand.u32 4294901760, %v164_v51  ;;  %2754 = vmatprep.subr.bf16.mxu0 %v3306_v42  ;;  %1482 = vrot.lane.b32.xlu0 %v3295_v19, %s3065_s15  ;;  %v144_v56 = vsel %vm3215_vm7, %v140_v9, 0.0  ;;  %v271_v31 = vsub.f32 %v3197_v45, %v270_v55 }
  0xa7   :  { %v278_v7 = vand.u32 4294901760, %v277_v41  ;;  %1421 = vrot.lane.b32.xlu1 %v3295_v19, %s3066_s16 }
  0xa8   :  { %v3338_v35 = vsub.f32 %v164_v51, %v202_v11  ;;  %v138_v25 = vpop.permute.xlu0 %137  ;;  %v3340_v33 = vpack.c.bf16 %v202_v11, %v198_v20  ;;  %v3354_v30 = vpack.c.bf16 %v4041_v62, %v4040_v15  ;;  %v3356_v20 = vsub.f32 %v118_v44, %v194_v47 }
  0xa9   :  { %v141_v29 = vsel %vm139_vm13, %v136_v58, %v138_v25  ;;  %v4050_v51 = vand.u32 4294901760, %v3317_v53  ;;  %v284_v25 = vand.u32 4294901760, %v283_v3  ;;  %v307_v44 = vsub.f32 %v3227_v4, %v306_v14 }
  0xaa   :  { %4114 = vst [vmem:[#allocation12_spill] sm:$0xff] %v3354_v30  ;;  %v360_v11 = vand.u32 4294901760, %v3338_v35  ;;  %v145_v9 = vsel %vm3189_vm5, %v141_v29, 0.0  ;;  %2756 = vmatpush1.bf16.msra.mxu0 %v3340_v33  ;;  %v206_v29 = vand.u32 4294901760, %v144_v56  ;;  %v3374_v15 = vand.u32 4294901760, %v260_v63  ;;  %1419 = vrot.lane.b32.xlu0 %v3290_v1, %s3066_s16 }
  0xab   :  { %v204_v58 = vand.u32 4294901760, %v145_v9  ;;  %v3377_v62 = vand.u32 4294901760, %v3315_v52  ;;  %v290_v14 = vand.u32 4294901760, %v289_v34  ;;  %v4053_v3 = vmov 1.0   ;;  %1433 = vrot.lane.b32.xlu1 %v3295_v19, %s3067_s17 }
  0xac   :  { %v3381_v0 = vpack.c.bf16 %v360_v11, %v4050_v51  ;;  %v272_v55 = vand.u32 4294901760, %v271_v31  ;;  %v295_v63 = vsub.f32 %v3219_v61, %v294_v17  ;;  %v3396_v38 = vpack.c.bf16 %v4053_v3, %v206_v29 }
  0xad   :  { %v3386_v59 = vpack.c.bf16 %v4053_v3, %v204_v58  ;;  %v3400_v34 = vsub.f32 %v145_v9, %v204_v58  ;;  %v308_v41 = vand.u32 4294901760, %v307_v44  ;;  %v4119_v31 = vand.u32 4294901760, %v3324_v22 }
  0xae   :  { %4117 = vst [vmem:[#allocation13_spill] sm:$0xff] %v3381_v0  ;;  %v2763_v17 = vpack.c.bf16 %v284_v25, %v272_v55  ;;  %v4120_v51 = vand.u32 4294901760, %v3237_v18  ;;  %1431 = vrot.lane.b32.xlu0 %v3290_v1, %s3067_s17  ;;  %v3416_v9 = vsub.f32 %v2725_v39, %v2725_v39  ;;  %v296_v55 = vand.u32 4294901760, %v295_v63 }
  0xaf   :  { %2759 = vmatprep.subr.msk.bf16.mxu0 %vm3370_vm15, %v3386_v59  ;;  %v331_v5 = vsub.f32 %v3324_v22, %v4119_v31  ;;  %v325_v58 = vsub.f32 %v3315_v52, %v3377_v62  ;;  %v302_v25 = vand.u32 4294901760, %v301_v60  ;;  %v4122_v44 = vand.u32 4294901760, %v3356_v20 }
  0xb0   :  { %v313_v3 = vsub.f32 %v3237_v18, %v4120_v51  ;;  %2762 = vmatpush1.bf16.msk.msra.mxu0 %vm3370_vm15, %v3396_v38  ;;  %4121 = vst [vmem:[#allocation14_spill] sm:$0xff] %v3416_v9  ;;  %v3423_v51 = vsub.f32 %v144_v56, %v206_v29  ;;  %v2765_v16 = vpack.c.bf16 %v290_v14, %v278_v7  ;;  %v366_v32 = vand.u32 4294901760, %v3400_v34 }
  0xb1   :  { %2764 = vmatprep.subr.bf16.mxu0 %v2763_v17  ;;  %v337_v31 = vsub.f32 %v3356_v20, %v4122_v44  ;;  %v2767_v39 = vpack.c.bf16 %v308_v41, %v296_v55  ;;  %v332_v63 = vand.u32 4294901760, %v331_v5  ;;  %v4123_v17 = vand.u32 4294901760, %v3304_v40 }
  0xb2   :  { %v314_v0 = vand.u32 4294901760, %v313_v3  ;;  %v4124_v30 = vmov 0.0   ;;  %v3433_v56 = vand.u32 4294901760, %v325_v58  ;;  %v4125_v7 = vand.u32 4294901760, %v3299_v24 }
  0xb3   :  { %262 = vmatmul.mubr.f32.vlgmr.msra.gmra.mrb[0].mxu0 %v3374_v15  ;;  %v355_v60 = vsub.f32 %v3304_v40, %v4123_v17  ;;  %v3439_v14 = vand.u32 4294901760, %v3416_v9  ;;  %1417 = vrot.lane.b32.xlu0 %v4124_v30, %s3066_s16  ;;  %v338_v41 = vand.u32 4294901760, %v337_v31  ;;  %v361_v5 = vsub.f32 %v3338_v35, %v360_v11 }
  0xb4   :  { %2766 = vmatpush1.bf16.msra.mxu0 %v2765_v16  ;;  %432 = vmatprep.mubr.f32.mxu0 %v4124_v30  ;;  %v343_v29 = vsub.f32 %v3299_v24, %v4125_v7  ;;  %v372_v16 = vand.u32 4294901760, %v3423_v51  ;;  %v2769_v3 = vpack.c.bf16 %v314_v0, %v302_v25  ;;  %v2771_v55 = vpack.c.bf16 %v332_v63, %v3141_v10 }
  0xb5   :  { %2768 = vmatprep.subr.bf16.mxu0 %v2767_v39  ;;  %4126 = vst [vmem:[#allocation15_spill] sm:$0xff] %v3439_v14  ;;  %1429 = vrot.lane.b32.xlu1 %v4124_v30, %s3067_s17  ;;  %v356_v58 = vand.u32 4294901760, %v355_v60  ;;  %v367_v44 = vsub.f32 %v3400_v34, %v366_v32  ;;  %v4127_v39 = vand.u32 4294901760, %v3317_v53  ;;  %v379_v0 = vsub.f32 %v3416_v9, %v3439_v14 }
  0xb6   :  { %v344_v11 = vand.u32 4294901760, %v343_v29  ;;  %v362_v25 = vand.u32 4294901760, %v361_v5  ;;  %v373_v10 = vsub.f32 %v3423_v51, %v372_v16  ;;  %v2773_v31 = vpack.c.bf16 %v338_v41, %v3433_v56 }
  0xb7   :  { %v349_v17 = vsub.f32 %v3317_v53, %v4127_v39  ;;  %1444 = vrot.lane.b32.xlu0 %v3295_v19, %s3068_s18  ;;  %v368_v60 = vand.u32 4294901760, %v367_v44  ;;  %v3464_v29 = vand.u32 4294901760, %v379_v0  ;;  %v2785_v44 = vpack.c.bf16 %v3170_v26, %v3172_v28 }
  0xb8   :  { %2770 = vmatpush1.bf16.msra.mxu0 %v2769_v3  ;;  %v2775_v63 = vpack.c.bf16 %v356_v58, %v344_v11  ;;  %v374_v5 = vand.u32 4294901760, %v373_v10  ;;  %v2783_v58 = vpack.c.bf16 %v3199_v48, %v3197_v45  ;;  %v2787_v39 = vpack.c.bf16 %v3227_v4, %v3219_v61 }
  0xb9   :  { %2772 = vmatprep.subr.bf16.mxu0 %v2771_v55  ;;  %1446 = vrot.lane.b32.xlu1 %v4124_v30, %s3068_s18  ;;  %v350_v7 = vand.u32 4294901760, %v349_v17  ;;  %4128 = vst [vmem:[#allocation16_spill] sm:$0xff] %v3464_v29  ;;  %v2779_v41 = vpack.c.bf16 %v3464_v29, %v368_v60  ;;  %v2789_v45 = vpack.c.bf16 %v3237_v18, %v3239_v21  ;;  %v4129_v21 = vand.u32 4294901760, %v3324_v22 }
  0xba   :  { %v2781_v55 = vpack.c.bf16 %v3464_v29, %v374_v5  ;;  %v2791_v26 = vpack.c.bf16 %v3324_v22, %v3127_v6  ;;  %v2793_v28 = vpack.c.bf16 %v3356_v20, %v3315_v52  ;;  %v2795_v48 = vpack.c.bf16 %v3304_v40, %v3299_v24 }
  0xbb   :  { %1442 = vrot.lane.b32.xlu0 %v3290_v1, %s3068_s18  ;;  %v2777_v3 = vpack.c.bf16 %v362_v25, %v350_v7  ;;  %v2797_v61 = vpack.c.bf16 %v3338_v35, %v3317_v53  ;;  %v2799_v4 = vpack.c.bf16 %v3416_v9, %v3400_v34  ;;  %v2801_v18 = vpack.c.bf16 %v3416_v9, %v3423_v51  ;;  %v4132_v53 = vld [vmem:[#allocation13_spill] sm:$0xff] }
  0xbc   :  { %2774 = vmatpush1.bf16.msra.mxu0 %v2773_v31  ;;  %v2833_v35 = vpack.c.bf16 %v4129_v21, %v3133_v8  ;;  %v4130_v24 = vand.u32 4294901760, %v3356_v20 }
  0xbd   :  { %2776 = vmatprep.subr.bf16.mxu0 %v2775_v63  ;;  %1456 = vrot.lane.b32.xlu1 %v3295_v19, %s3069_s19 }
  0xbe   :  { %v2835_v40 = vpack.c.bf16 %v4130_v24, %v3377_v62 }
  0xbf   :  { %1458 = vrot.lane.b32.xlu0 %v4124_v30, %s3069_s19 }
  0xc0   :  { %2778 = vmatpush1.bf16.msra.mxu0 %v2777_v3 }
  0xc1   :  { %2780 = vmatprep.subr.bf16.mxu0 %v2779_v41  ;;  %1454 = vrot.lane.b32.xlu1 %v3290_v1, %s3069_s19 }
  0xc3   :  { %1490 = vrot.lane.b32.xlu0 %v3295_v19, %s3070_s20 }
  0xc4   :  { %2782 = vmatpush1.bf16.msra.mxu0 %v2781_v55 }
  0xc5   :  { %2784 = vmatprep.subr.bf16.mxu0 %v2783_v58  ;;  %1492 = vrot.lane.b32.xlu1 %v4124_v30, %s3070_s20 }
  0xc7   :  { %434 = vmatmul.mubr.f32.vlgmr.msra.gmra.mrb[0].mxu0 %v3274_v49  ;;  %1488 = vrot.lane.b32.xlu0 %v3290_v1, %s3070_s20 }
  0xc8   :  { %2786 = vmatpush1.bf16.msra.mxu0 %v2785_v44  ;;  %544 = vmatprep.mubr.f32.mxu0 %v4124_v30 }
  0xc9   :  { %2788 = vmatprep.subr.bf16.mxu0 %v2787_v39  ;;  %1468 = vrot.lane.b32.xlu1 %v3295_v19, %s3071_s21 }
  0xcb   :  { %1470 = vrot.lane.b32.xlu0 %v4124_v30, %s3071_s21 }
  0xcc   :  { %2790 = vmatpush1.bf16.msra.mxu0 %v2789_v45 }
  0xcd   :  { %2792 = vmatprep.subr.bf16.mxu0 %v2791_v26  ;;  %1466 = vrot.lane.b32.xlu1 %v3290_v1, %s3071_s21 }
  0xd0   :  { %2794 = vmatpush1.bf16.msra.mxu0 %v2793_v28 }
  0xd1   :  { %2796 = vmatprep.subr.bf16.mxu0 %v2795_v48 }
  0xd4   :  { %2798 = vmatpush1.bf16.msra.mxu0 %v2797_v61 }
  0xd5   :  { %2800 = vmatprep.subr.bf16.mxu0 %v2799_v4 }
  0xd8   :  { %2802 = vmatpush1.bf16.msra.mxu0 %v2801_v18 }
  0xd9   :  { %2804 = vmatprep.subr.bf16.mxu0 %v3201_v50 }
  0xdb   :  { %547 = vmatmul.mubr.f32.vlgmr.msra.gmra.mrb[0].mxu0 %v3288_v13 }
  0xdc   :  { %2806 = vmatpush1.bf16.msra.mxu0 %v3205_v54  ;;  %637 = vmatprep.mubr.f32.mxu0 %v4124_v30 }
  0xdd   :  { %2808 = vmatprep.subr.bf16.mxu0 %v3230_v12 }
  0xe0   :  { %2810 = vmatpush1.bf16.msra.mxu0 %v3242_v23 }
  0xe1   :  { %2812 = vmatprep.subr.bf16.mxu0 %v3263_v43 }
  0xe4   :  { %2814 = vmatpush1.bf16.msra.mxu0 %v3279_v57 }
  0xe5   :  { %2816 = vmatprep.subr.bf16.mxu0 %v3306_v42 }
  0xe8   :  { %2818 = vmatpush1.bf16.msra.mxu0 %v3340_v33 }
  0xe9   :  { %2821 = vmatprep.subr.msk.bf16.mxu0 %vm3370_vm15, %v3386_v59 }
  0xec   :  { %2824 = vmatpush1.bf16.msk.msra.mxu0 %vm3370_vm15, %v3396_v38 }
  0xed   :  { %2826 = vmatprep.subr.bf16.mxu0 %v3225_v2  ;;  %v4131_v2 = vld [vmem:[#allocation12_spill] sm:$0xff] }
  0xef   :  { %641 = vmatmul.mubr.f32.vlgmr.msra.gmra.mrb[0].mxu0 %v3302_v37 }
  0xf0   :  { %2828 = vmatpush1.bf16.msra.mxu0 %v3185_v36  ;;  %771 = vmatprep.mubr.f32.mxu0 %v4124_v30  ;;  %v2841_v36 = vpack.c.bf16 %v3439_v14, %v366_v32 }
  0xf1   :  { %2830 = vmatprep.subr.bf16.mxu0 %v3253_v27  ;;  %v2843_v27 = vpack.c.bf16 %v3439_v14, %v372_v16 }
  0xf4   :  { %2832 = vmatpush1.bf16.msra.mxu0 %v3271_v46 }
  0xf5   :  { %2834 = vmatprep.subr.bf16.mxu0 %v2833_v35 }
  0xf8   :  { %2836 = vmatpush1.bf16.msra.mxu0 %v2835_v40 }
  0xf9   :  { %2838 = vmatprep.subr.bf16.mxu0 %v4131_v2 }
  0xfc   :  { %2840 = vmatpush1.bf16.msra.mxu0 %v4132_v53 }
  0xfd   :  { %2842 = vmatprep.subr.bf16.mxu0 %v2841_v36 }
 0x100   :  { %2844 = vmatpush1.bf16.msra.mxu0 %v2843_v27 }
 0x101   :  { %2846 = vmatprep.subr.bf16.mxu0 %v3201_v50 }
 0x103   :  { %773 = vmatmul.mubr.f32.vlgmr.msra.gmra.mrb[0].mxu0 %v3274_v49 }
 0x104   :  { %2848 = vmatpush1.bf16.msra.mxu0 %v3205_v54  ;;  %863 = vmatprep.mubr.f32.mxu0 %v4124_v30 }
 0x105   :  { %2850 = vmatprep.subr.bf16.mxu0 %v3230_v12 }
 0x108   :  { %2852 = vmatpush1.bf16.msra.mxu0 %v3242_v23 }
 0x109   :  { %2854 = vmatprep.subr.bf16.mxu0 %v3263_v43 }
 0x10c   :  { %2856 = vmatpush1.bf16.msra.mxu0 %v3279_v57  ;;  %v1410_v50 = vpop.permute.xlu1 %1409 }
 0x10d   :  { %2858 = vmatprep.subr.bf16.mxu0 %v3306_v42 }
 0x110   :  { %2860 = vmatpush1.bf16.msra.mxu0 %v3340_v33  ;;  %v1408_v32 = vpop.permute.xlu0 %1407  ;;  %v1481_v12 = vpop.permute.xlu1 %1480 }
 0x111   :  { %2863 = vmatprep.subr.msk.bf16.mxu0 %vm3370_vm15, %v3386_v59  ;;  %v1412_v43 = vsel %vm73_vm0, %v1408_v32, %v1410_v50 }
 0x112   :  { %v3567_v42 = vsel %vm3176_vm3, %v1412_v43, 0.0 }
 0x113   :  { %v4078_v34 = vand.u32 4294901760, %v3567_v42 }
 0x114   :  { %2866 = vmatpush1.bf16.msk.msra.mxu0 %vm3370_vm15, %v3396_v38  ;;  %v1406_v54 = vpop.permute.xlu0 %1405  ;;  %v1479_v33 = vpop.permute.xlu1 %1478 }
 0x115   :  { %v1411_v46 = vsel %vm73_vm0, %v1406_v54, %v1408_v32  ;;  %v3577_v20 = vsel %vm152_vm1, %v1479_v33, %v1481_v12  ;;  %v3586_v25 = vsub.f32 %v3567_v42, %v4078_v34  ;;  %vm871_vm0 = vcmask 1042432  }
 0x116   :  { %v3574_v30 = vsel %vm3162_vm2, %v1411_v46, 0.0  ;;  %v4075_v17 = vand.u32 4294901760, %v3577_v20 }
 0x117   :  { %865 = vmatmul.mubr.f32.vlgmr.msra.gmra.mrb[0].mxu0 %v3274_v49  ;;  %v4076_v16 = vand.u32 4294901760, %v3574_v30  ;;  %v4066_v5 = vand.u32 4294901760, %v3586_v25 }
 0x118   :  { %v1483_v23 = vpop.permute.xlu0 %1482  ;;  %v3601_v63 = vsub.f32 %v3577_v20, %v4075_v17 }
 0x119   :  { %v3570_v22 = vsel %vm152_vm1, %v1481_v12, %v1483_v23  ;;  %v1422_v11 = vpop.permute.xlu1 %1421  ;;  %v3596_v31 = vsub.f32 %v3574_v30, %v4076_v16  ;;  %vm1388_vm1 = vcmask 64512  }
 0x11a   :  { %v4077_v51 = vand.u32 4294901760, %v3570_v22  ;;  %v4059_v44 = vand.u32 4294901760, %v3601_v63 }
 0x11b   :  { %v4062_v58 = vand.u32 4294901760, %v3596_v31 }
 0x11c   :  { %v1420_v59 = vpop.permute.xlu0 %1419  ;;  %v3591_v10 = vsub.f32 %v3570_v22, %v4077_v51 }
 0x11d   :  { %v1434_v60 = vpop.permute.xlu1 %1433  ;;  %v1424_v41 = vsel %vm86_vm4, %v1420_v59, %v1422_v11  ;;  %v3631_v21 = vpack.c.bf16 %v4059_v44, %v4062_v58 }
 0x11e   :  { %v4065_v3 = vand.u32 4294901760, %v3591_v10  ;;  %v3619_v61 = vsel %vm3189_vm5, %v1424_v41, 0.0 }
 0x11f   :  { %4137 = vst [vmem:[#allocation13_spill] sm:$0xff] %v3631_v21  ;;  %v4074_v2 = vand.u32 4294901760, %v3619_v61 }
 0x120   :  { %v1432_v0 = vpop.permute.xlu0 %1431  ;;  %v3615_v28 = vpack.c.bf16 %v4065_v3, %v4066_v5 }
 0x121   :  { %v1436_v55 = vsel %vm99_vm6, %v1432_v0, %v1434_v60  ;;  %v3652_v54 = vsub.f32 %v3619_v61, %v4074_v2 }
 0x122   :  { %4135 = vst [vmem:[#allocation12_spill] sm:$0xff] %v3615_v28  ;;  %v3623_v4 = vsel %vm3176_vm3, %v1436_v55, 0.0 }
 0x123   :  { %v4071_v36 = vand.u32 4294901760, %v3623_v4 }
 0x125   :  { %v1418_v7 = vpop.permute.xlu0 %1417  ;;  %v3657_v12 = vsub.f32 %v3623_v4, %v4071_v36 }
 0x126   :  { %v1423_v39 = vsel %vm86_vm4, %v1418_v7, %v1420_v59  ;;  %v4061_v59 = vand.u32 4294901760, %v3652_v54 }
 0x127   :  { %v1430_v45 = vpop.permute.xlu1 %1429  ;;  %v3635_v24 = vsel %vm3215_vm7, %v1423_v39, 0.0  ;;  %v4060_v11 = vand.u32 4294901760, %v3657_v12 }
 0x128   :  { %v1435_v26 = vsel %vm99_vm6, %v1430_v45, %v1432_v0  ;;  %v4069_v53 = vand.u32 4294901760, %v3635_v24 }
 0x129   :  { %v3625_v18 = vpop.permute.xlu0 %1444  ;;  %v3639_v40 = vsel %vm3162_vm2, %v1435_v26, 0.0  ;;  %v3679_v45 = vpack.c.bf16 %v4060_v11, %v4061_v59 }
 0x12a   :  { %v4067_v27 = vand.u32 4294901760, %v3639_v40  ;;  %v3662_v23 = vsub.f32 %v3635_v24, %v4069_v53 }
 0x12b   :  { %v3647_v50 = vpop.permute.xlu1 %1446  ;;  %4139 = vst [vmem:[#allocation6_spill] sm:$0xff] %v3679_v45 }
 0x12c   :  { %v3667_v43 = vsub.f32 %v3639_v40, %v4067_v27  ;;  %v4064_v0 = vand.u32 4294901760, %v3662_v23 }
 0x12d   :  { %v3645_v32 = vpop.permute.xlu0 %1442 }
 0x12e   :  { %v4063_v60 = vand.u32 4294901760, %v3667_v43 }
 0x12f   :  { %v1457_v33 = vpop.permute.xlu1 %1456 }
 0x130   :  { %v3685_v26 = vpack.c.bf16 %v4063_v60, %v4064_v0 }
 0x131   :  { %v1459_v46 = vpop.permute.xlu0 %1458 }
 0x132   :  { %v1461_v7 = vsel %vm126_vm10, %v1457_v33, %v1459_v46  ;;  %4140 = vst [vmem:[#allocation5_spill] sm:$0xff] %v3685_v26 }
 0x133   :  { %v1455_v55 = vpop.permute.xlu1 %1454  ;;  %v3689_v44 = vsel %vm3176_vm3, %v1461_v7, 0.0 }
 0x134   :  { %v1460_v39 = vsel %vm126_vm10, %v1455_v55, %v1457_v33  ;;  %v3696_v33 = vand.u32 4294901760, %v3295_v19  ;;  %v3699_v55 = vand.u32 4294901760, %v3290_v1  ;;  %v4068_v38 = vand.u32 4294901760, %v3689_v44 }
 0x135   :  { %v1491_v41 = vpop.permute.xlu0 %1490  ;;  %v3693_v46 = vsel %vm3162_vm2, %v1460_v39, 0.0 }
 0x136   :  { %v3709_v57 = vsub.f32 %v3295_v19, %v3696_v33  ;;  %2242 = vmatprep.subr.mxu0 %v3696_v33  ;;  %v4070_v7 = vand.u32 4294901760, %v3693_v46  ;;  %v3725_v19 = vsub.f32 %v3689_v44, %v4068_v38  ;;  %v3872_v35 = vsub.f32 %v3290_v1, %v3699_v55 }
 0x137   :  { %v1493_v59 = vpop.permute.xlu1 %1492  ;;  %2244 = vmatpush1.xpose.msra.mxu0 %v3699_v55 }
 0x138   :  { %v3705_v60 = vsel %vm163_vm11, %v1491_v41, %v1493_v59  ;;  %4141 = vst [vmem:[#allocation7_spill] sm:$0xff] %v3709_v57  ;;  %v4084_v38 = vand.u32 4294901760, %v3725_v19 }
 0x139   :  { %v1489_v11 = vpop.permute.xlu0 %1488  ;;  %v4073_v0 = vand.u32 4294901760, %v3705_v60  ;;  %v4157_v48 = vand.u32 4294901760, %v3705_v60 }
 0x13a   :  { %v3702_v58 = vsel %vm163_vm11, %v1489_v11, %v1491_v41  ;;  %v3718_v11 = vand.u32 4294901760, %v3709_v57  ;;  %v3730_v41 = vsub.f32 %v3693_v46, %v4070_v7 }
 0x13b   :  { %v4072_v39 = vand.u32 4294901760, %v3702_v58  ;;  %v3740_v5 = vsub.f32 %v3705_v60, %v4073_v0 }
 0x13c   :  { %4142 = vst [vmem:[#allocation8_spill] sm:$0xff] %v3718_v11  ;;  %v1645_v59 = vsub.f32 %v3709_v57, %v3718_v11  ;;  %v4087_v53 = vand.u32 4294901760, %v3730_v41 }
 0x13d   :  { %v3735_v3 = vsub.f32 %v3702_v58, %v4072_v39  ;;  %v4083_v36 = vand.u32 4294901760, %v3740_v5 }
 0x13e   :  { %v3742_v27 = vand.u32 4294901760, %v1645_v59 }
 0x13f   :  { %v4086_v7 = vand.u32 4294901760, %v3735_v3  ;;  %v3753_v39 = vpack.c.bf16 %v4083_v36, %v4084_v38 }
 0x140   :  { %2328 = vmatprep.subr.mxu0 %v3742_v27 }
 0x141   :  { %4143 = vst [vmem:[#allocation17_spill] sm:$0xff] %v3753_v39  ;;  %v3759_v59 = vpack.c.bf16 %v4086_v7, %v4087_v53 }
 0x143   :  { %4144 = vst [vmem:[#allocation18_spill] sm:$0xff] %v3759_v59 }
 0x1ea   :  { %v866_v0 = vpop.f32.mrb[0].mxu0 }
 0x1eb   :  { %v872_v2 = vsel %vm871_vm0, %v866_v0, -inf  ;;  %v868_v17 = vpop.f32.mrb[1].mxu0 }
 0x1ec   :  { %v873_v16 = vrot.slane %v872_v2, 4  ;;  %v879_v51 = vsel %vm871_vm0, %v868_v17, -inf }
 0x1ed   :  { %v880_v34 = vrot.slane %v879_v51, 4 }
 0x1ee   :  { %v874_v14 = vmax.f32 %v872_v2, %v873_v16 }
 0x1ef   :  { %v881_v26 = vmax.f32 %v879_v51, %v880_v34 }
 0x1f0   :  { %v875_v11 = vrot.slane %v874_v14, 2 }
 0x1f1   :  { %v882_v36 = vrot.slane %v881_v26, 2 }
 0x1f2   :  { %v876_v38 = vmax.f32 %v874_v14, %v875_v11 }
 0x1f3   :  { %v883_v39 = vmax.f32 %v881_v26, %v882_v36 }
 0x1f4   :  { %v877_v45 = vrot.slane %v876_v38, 1 }
 0x1f5   :  { %v884_v21 = vrot.slane %v883_v39, 1 }
 0x1f6   :  { %v878_v37 = vmax.f32 %v876_v38, %v877_v45 }
 0x1f7   :  { %v885_v7 = vmax.f32 %v883_v39, %v884_v21 }
 0x1f8   :  { %v886_v53 = vsub.f32 %v866_v0, %v878_v37 }
 0x1f9   :  { %v887_v59 = vsub.f32 %v868_v17, %v885_v7 }
 0x1fa   :  { %v888_v28 = vmul.f32 1.442695, %v886_v53 }
 0x1fb   :  { %v890_v13 = vmul.f32 1.442695, %v887_v59 }
 0x1fc   :  { %3046 = vpow2.f32 %v888_v28 }
 0x1fd   :  { %3048 = vpow2.f32 %v890_v13 }
 0x206   :  { %v3047_v9 = vpop.eup %3046 }
 0x207   :  { %v3049_v57 = vpop.eup %3048  ;;  %v892_v49 = vsel %vm871_vm0, %v3047_v9, 0.0 }
 0x208   :  { %v893_v16 = vrot.slane %v892_v49, 4  ;;  %v899_v34 = vsel %vm871_vm0, %v3049_v57, 0.0 }
 0x209   :  { %v900_v51 = vrot.slane %v899_v34, 4 }
 0x20a   :  { %v894_v14 = vadd.f32 %v893_v16, %v892_v49 }
 0x20b   :  { %v901_v2 = vadd.f32 %v900_v51, %v899_v34 }
 0x20c   :  { %v895_v36 = vrot.slane %v894_v14, 2 }
 0x20d   :  { %v902_v26 = vrot.slane %v901_v2, 2 }
 0x20e   :  { %v896_v45 = vadd.f32 %v895_v36, %v894_v14 }
 0x20f   :  { %v903_v21 = vadd.f32 %v902_v26, %v901_v2  ;;  %v4150_v26 = vand.u32 4294901760, %v3577_v20 }
 0x210   :  { %v897_v37 = vrot.slane %v896_v45, 1 }
 0x211   :  { %v904_v17 = vrot.slane %v903_v21, 1 }
 0x212   :  { %v898_v53 = vadd.f32 %v897_v37, %v896_v45  ;;  %v4151_v37 = vand.u32 4294901760, %v3619_v61  ;;  %v4153_v61 = vand.u32 4294901760, %v3635_v24 }
 0x213   :  { %v905_v0 = vadd.f32 %v904_v17, %v903_v21  ;;  %v1471_v21 = vpop.permute.xlu0 %1470 }
 0x214   :  { %3050 = vrcp.f32 %v898_v53 }
 0x215   :  { %3052 = vrcp.f32 %v905_v0 }
 0x21e   :  { %v3051_v13 = vpop.eup %3050 }
 0x21f   :  { %v3053_v28 = vpop.eup %3052  ;;  %v908_v38 = vmul.f32 %v3051_v13, %v3047_v9  ;;  %v4145_v9 = vld [vmem:[#allocation3_spill] sm:$0xff] }
 0x220   :  { %v909_v7 = vmul.f32 %v3053_v28, %v3049_v57  ;;  %v4146_v57 = vld [vmem:[#allocation4_spill] sm:$0xff] }
 0x221   :  { %v987_v39 = vand.u32 4294901760, %v908_v38 }
 0x222   :  { %v981_v11 = vand.u32 4294901760, %v909_v7  ;;  %v912_v59 = vcombine.low %v908_v38, %v909_v7 }
 0x223   :  { %v988_v29 = vsub.f32 %v908_v38, %v987_v39 }
 0x224   :  { %v982_v49 = vsub.f32 %v909_v7, %v981_v11  ;;  %914 = vst [vmem:[%s4036_s2] sm:$0x77] %v912_v59 }
 0x225   :  { %v989_v16 = vand.u32 4294901760, %v988_v29 }
 0x226   :  { %v983_v34 = vand.u32 4294901760, %v982_v49 }
 0x227   :  { %v990_v51 = vsub.f32 %v988_v29, %v989_v16 }
 0x228   :  { %v984_v14 = vsub.f32 %v982_v49, %v983_v34 }
 0x229   :  { %v991_v36 = vand.u32 4294901760, %v990_v51 }
 0x22a   :  { %v985_v2 = vand.u32 4294901760, %v984_v14  ;;  %v4159_v14 = vand.u32 4294901760, %v3596_v31 }
 0x22c   :  { %986 = vmatprep.mubr.f32.mxu1 %v985_v2  ;;  %v1603_v2 = vsub.f32 %v3596_v31, %v4159_v14 }
 0x22d   :  { %992 = vmatmul.mubr.f32.vlgmr.msra.gmra.mrb[0].mxu1 %v991_v36  ;;  %v4160_v36 = vand.u32 4294901760, %v3601_v63 }
 0x22e   :  { %1008 = vmatpush1.xpose.msra.mxu1 %v3433_v56  ;;  %1072 = vmatprep.mubr.f32.mxu1 %v981_v11 }
 0x22f   :  { %1081 = vmatprep.subr.mxu1 %v3127_v6  ;;  %v4147_v6 = vand.u32 4294901760, %v3567_v42  ;;  %v1448_v42 = vsel %vm113_vm8, %v3645_v32, %v3625_v18 }
 0x230   :  { %v1452_v20 = vsel %vm3215_vm7, %v1448_v42, 0.0  ;;  %v4165_v42 = vand.u32 4294901760, %v3657_v12 }
 0x231   :  { %v1520_v28 = vand.u32 4294901760, %v1452_v20 }
 0x233   :  { %v3826_v7 = vpack.c.bf16 %v1520_v28, %v3699_v55 }
 0x235   :  { %1074 = vmatmul.mubr.f32.vlgmr.msra.gmra.mrb[0].mxu1 %v987_v39 }
 0x236   :  { %1084 = vmatpush1.xpose.msra.mxu1 %v3315_v52  ;;  %1149 = vmatprep.mubr.f32.mxu1 %v982_v49  ;;  %v4148_v52 = vand.u32 4294901760, %v3570_v22  ;;  %v4156_v49 = vand.u32 4294901760, %v3689_v44  ;;  %v4161_v44 = vmov 1.0  }
 0x237   :  { %1158 = vmatprep.subr.mxu1 %v4145_v9 }
 0x238   :  { %v3780_v56 = vpack.c.bf16 %v4148_v52, %v4147_v6  ;;  %v4162_v52 = vand.u32 4294901760, %v3693_v46 }
 0x23d   :  { %1152 = vmatmul.mubr.f32.vlgmr.msra.gmra.mrb[0].mxu1 %v988_v29  ;;  %v4149_v29 = vand.u32 4294901760, %v3574_v30  ;;  %v3805_v30 = vld [vmem:[#allocation2] sm:$0xff] }
 0x23e   :  { %1160 = vmatpush1.xpose.msra.mxu1 %v4146_v57  ;;  %1226 = vmatprep.mubr.f32.mxu1 %v983_v34  ;;  %v4158_v34 = vand.u32 4294901760, %v3591_v10 }
 0x23f   :  { %1238 = vmatprep.subr.mxu1 %v3133_v8  ;;  %v1449_v8 = vsel %vm113_vm8, %v3625_v18, %v3647_v50  ;;  %v3791_v45 = vpack.c.bf16 %v4150_v26, %v4149_v29  ;;  %v4152_v50 = vand.u32 4294901760, %v3623_v4  ;;  %v4154_v4 = vand.u32 4294901760, %v3639_v40 }
 0x240   :  { %v1453_v22 = vsel %vm3189_vm5, %v1449_v8, 0.0  ;;  %v4155_v40 = vand.u32 4294901760, %v3586_v25  ;;  %v1609_v51 = vsub.f32 %v3591_v10, %v4158_v34  ;;  %v4163_v8 = vand.u32 4294901760, %v3702_v58 }
 0x241   :  { %v3802_v17 = vpack.c.bf16 %v4152_v50, %v4151_v37  ;;  %v1518_v18 = vand.u32 4294901760, %v1453_v22  ;;  %v3816_v53 = vpack.c.bf16 %v4154_v4, %v4153_v61  ;;  %v4164_v29 = vand.u32 4294901760, %v3652_v54 }
 0x242   :  { %v1610_v46 = vand.u32 4294901760, %v1609_v51  ;;  %v1604_v50 = vand.u32 4294901760, %v1603_v2  ;;  %v4167_v61 = vand.u32 4294901760, %v3667_v43 }
 0x243   :  { %v3819_v13 = vpack.c.bf16 %v1518_v18, %v3696_v33  ;;  %v1621_v26 = vsub.f32 %v3652_v54, %v4164_v29  ;;  %v4169_v29 = vand.u32 4294901760, %v3740_v5 }
 0x244   :  { %v1639_v4 = vsub.f32 %v3667_v43, %v4167_v61 }
 0x245   :  { %1230 = vmatmul.mubr.f32.vlgmr.msra.gmra.mrb[0].mxu1 %v989_v16  ;;  %v3838_v16 = vpack.c.bf16 %v4157_v48, %v4156_v49 }
 0x246   :  { %1242 = vmatpush1.xpose.msra.mxu1 %v3377_v62  ;;  %1306 = vmatprep.mubr.f32.mxu1 %v981_v11  ;;  %v1469_v62 = vpop.permute.xlu1 %1468  ;;  %v1640_v51 = vand.u32 4294901760, %v1639_v4 }
 0x247   :  { %1314 = vmatprep.subr.mxu1 %v4145_v9  ;;  %v1473_v32 = vsel %vm139_vm13, %v1469_v62, %v1471_v21  ;;  %v1615_v9 = vsub.f32 %v3601_v63, %v4160_v36 }
 0x248   :  { %v1477_v38 = vsel %vm3189_vm5, %v1473_v32, 0.0 }
 0x249   :  { %v1530_v59 = vand.u32 4294901760, %v1477_v38 }
 0x24a   :  { %v1467_v0 = vpop.permute.xlu1 %1466 }
 0x24b   :  { %v1472_v24 = vsel %vm139_vm13, %v1467_v0, %v1469_v62  ;;  %v3853_v60 = vpack.c.bf16 %v4161_v44, %v1530_v59  ;;  %v3862_v62 = vpack.c.bf16 %v4163_v8, %v4162_v52  ;;  %v4168_v52 = vand.u32 4294901760, %v3725_v19 }
 0x24c   :  { %v1476_v6 = vsel %vm3215_vm7, %v1472_v24, 0.0 }
 0x24d   :  { %1308 = vmatmul.mubr.f32.vlgmr.msra.gmra.mrb[0].mxu1 %v987_v39  ;;  %v1532_v58 = vand.u32 4294901760, %v1476_v6  ;;  %v1669_v8 = vsub.f32 %v3725_v19, %v4168_v52  ;;  %v4173_v52 = vld [vmem:[#allocation9_spill] sm:$0xff] }
 0x24e   :  { %1316 = vmatpush1.xpose.msra.mxu1 %v4146_v57  ;;  %1380 = vmatprep.mubr.f32.mxu1 %v981_v11  ;;  %v3832_v11 = vsub.f32 %v1453_v22, %v1518_v18  ;;  %v3850_v57 = vsub.f32 %v1452_v20, %v1520_v28  ;;  %v1633_v22 = vsub.f32 %v3657_v12, %v4165_v42  ;;  %v1616_v20 = vand.u32 4294901760, %v1615_v9 }
 0x24f   :  { %2868 = vmatprep.subr.bf16.mxu1 %v3780_v56  ;;  %v4166_v18 = vand.u32 4294901760, %v3662_v23  ;;  %v3887_v0 = vpack.c.bf16 %v4161_v44, %v1532_v58  ;;  %v1622_v28 = vand.u32 4294901760, %v1621_v26  ;;  %v3903_v2 = vsub.f32 %v1476_v6, %v1532_v58 }
 0x250   :  { %v1656_v21 = vand.u32 4294901760, %v3832_v11  ;;  %v1662_v1 = vand.u32 4294901760, %v3850_v57  ;;  %v1634_v24 = vand.u32 4294901760, %v1633_v22  ;;  %v1681_v26 = vsub.f32 %v3740_v5, %v4169_v29 }
 0x251   :  { %v1627_v32 = vsub.f32 %v3662_v23, %v4166_v18  ;;  %v4170_v22 = vand.u32 4294901760, %v3730_v41  ;;  %v1670_v18 = vand.u32 4294901760, %v1669_v8  ;;  %v2913_v8 = vpack.c.bf16 %v3657_v12, %v3652_v54  ;;  %v4175_v54 = vld [vmem:[#allocation14_spill] sm:$0xff] }
 0x252   :  { %v1657_v48 = vsub.f32 %v3832_v11, %v1656_v21  ;;  %v1663_v14 = vsub.f32 %v3850_v57, %v1662_v1  ;;  %v2915_v29 = vpack.c.bf16 %v3667_v43, %v3662_v23  ;;  %v2927_v23 = vpack.c.bf16 %v4175_v54, %v3903_v2  ;;  %v4176_v43 = vld [vmem:[#allocation10_spill] sm:$0xff] }
 0x253   :  { %v1628_v34 = vand.u32 4294901760, %v1627_v32  ;;  %v1682_v32 = vand.u32 4294901760, %v1681_v26  ;;  %v4174_v26 = vld [vmem:[#allocation7_spill] sm:$0xff] }
 0x254   :  { %v1658_v44 = vand.u32 4294901760, %v1657_v48  ;;  %v1664_v6 = vand.u32 4294901760, %v1663_v14  ;;  %v4172_v14 = vld [vmem:[#allocation16_spill] sm:$0xff] }
 0x255   :  { %1382 = vmatmul.mubr.f32.vlgmr.msra.gmra.mrb[0].mxu1 %v987_v39  ;;  %v1597_v39 = vsub.f32 %v3586_v25, %v4155_v40  ;;  %v3890_v40 = vand.u32 4294901760, %v3872_v35  ;;  %v2895_v42 = vpack.c.bf16 %v1640_v51, %v1628_v34  ;;  %v2901_v48 = vpack.c.bf16 %v1682_v32, %v1670_v18  ;;  %v4185_v18 = vld [vmem:[#allocation18_spill] sm:$0xff] }
 0x256   :  { %2870 = vmatpush1.bf16.msra.mxu1 %v3791_v45  ;;  %1582 = vmatprep.mubr.f32.mxu1 %v3805_v30 }
 0x257   :  { %2872 = vmatprep.subr.bf16.mxu1 %v3802_v17  ;;  %v1598_v37 = vand.u32 4294901760, %v1597_v39  ;;  %v3892_v39 = vsub.f32 %v1477_v38, %v1530_v59  ;;  %v2891_v38 = vpack.c.bf16 %v1616_v20, %v1604_v50  ;;  %v2893_v59 = vpack.c.bf16 %v1634_v24, %v1622_v28 }
 0x258   :  { %v1651_v36 = vsub.f32 %v3872_v35, %v3890_v40  ;;  %v1698_v50 = vand.u32 4294901760, %v3903_v2  ;;  %v2897_v20 = vpack.c.bf16 %v1658_v44, %v3742_v27  ;;  %v2911_v44 = vpack.c.bf16 %v3601_v63, %v3596_v31 }
 0x259   :  { %v2889_v49 = vpack.c.bf16 %v1610_v46, %v1598_v37  ;;  %v1692_v9 = vand.u32 4294901760, %v3892_v39  ;;  %v1675_v37 = vsub.f32 %v3730_v41, %v4170_v22  ;;  %v2921_v31 = vpack.c.bf16 %v3740_v5, %v3725_v19  ;;  %v4177_v5 = vld [vmem:[#allocation12_spill] sm:$0xff]  ;;  %v4179_v19 = vld [vmem:[#allocation13_spill] sm:$0xff] }
 0x25a   :  { %2874 = vmatpush1.bf16.msra.mxu1 %v3816_v53  ;;  %v3923_v58 = vand.u32 4294901760, %v1651_v36  ;;  %v1699_v24 = vsub.f32 %v3903_v2, %v1698_v50  ;;  %v2909_v36 = vpack.c.bf16 %v3591_v10, %v3586_v25  ;;  %v2917_v25 = vpack.c.bf16 %v3832_v11, %v4174_v26  ;;  %v4182_v22 = vld [vmem:[#allocation5_spill] sm:$0xff] }
 0x25b   :  { %2876 = vmatprep.subr.bf16.mxu1 %v3819_v13  ;;  %v1693_v61 = vsub.f32 %v3892_v39, %v1692_v9  ;;  %v1676_v4 = vand.u32 4294901760, %v1675_v37  ;;  %v2919_v10 = vpack.c.bf16 %v3850_v57, %v3872_v35  ;;  %v2923_v63 = vpack.c.bf16 %v3735_v3, %v3730_v41  ;;  %v4180_v41 = vld [vmem:[#allocation6_spill] sm:$0xff] }
 0x25c   :  { %v1700_v27 = vand.u32 4294901760, %v1699_v24  ;;  %v2925_v12 = vpack.c.bf16 %v4175_v54, %v3892_v39  ;;  %v2961_v37 = vpack.c.bf16 %v1662_v1, %v3890_v40 }
 0x25d   :  { %v1694_v34 = vand.u32 4294901760, %v1693_v61 }
 0x25e   :  { %2878 = vmatpush1.bf16.msra.mxu1 %v3826_v7 }
 0x25f   :  { %2880 = vmatprep.subr.bf16.mxu1 %v3838_v16 }
 0x262   :  { %2882 = vmatpush1.bf16.msra.mxu1 %v3862_v62 }
 0x263   :  { %2885 = vmatprep.subr.msk.bf16.mxu1 %vm3370_vm15, %v3853_v60 }
 0x266   :  { %2888 = vmatpush1.bf16.msk.msra.mxu1 %vm3370_vm15, %v3887_v0 }
 0x267   :  { %2890 = vmatprep.subr.bf16.mxu1 %v2889_v49  ;;  %v2899_v49 = vpack.c.bf16 %v1664_v6, %v3923_v58  ;;  %v4181_v6 = vld [vmem:[#allocation8_spill] sm:$0xff] }
 0x269   :  { %1588 = vmatmul.mubr.f32.vlgmr.msra.gmra.mrb[2].mxu1 %v3374_v15  ;;  %v4171_v15 = vand.u32 4294901760, %v3735_v3 }
 0x26a   :  { %2892 = vmatpush1.bf16.msra.mxu1 %v2891_v38  ;;  %1758 = vmatprep.mubr.f32.mxu1 %v3805_v30  ;;  %v2905_v38 = vpack.c.bf16 %v4172_v14, %v1694_v34 }
 0x26b   :  { %2894 = vmatprep.subr.bf16.mxu1 %v2893_v59  ;;  %v1687_v46 = vsub.f32 %v3735_v3, %v4171_v15  ;;  %v2907_v59 = vpack.c.bf16 %v4172_v14, %v1700_v27  ;;  %v4178_v3 = vld [vmem:[#allocation11_spill] sm:$0xff]  ;;  %v4183_v15 = vld [vmem:[#allocation17_spill] sm:$0xff] }
 0x26d   :  { %v1688_v28 = vand.u32 4294901760, %v1687_v46  ;;  %v4184_v46 = vld [vmem:[#allocation15_spill] sm:$0xff] }
 0x26e   :  { %2896 = vmatpush1.bf16.msra.mxu1 %v2895_v42  ;;  %v2959_v42 = vpack.c.bf16 %v1656_v21, %v4181_v6  ;;  %v2969_v11 = vpack.c.bf16 %v4184_v46, %v1698_v50 }
 0x26f   :  { %2898 = vmatprep.subr.bf16.mxu1 %v2897_v20  ;;  %v2903_v51 = vpack.c.bf16 %v1688_v28, %v1676_v4  ;;  %v2967_v20 = vpack.c.bf16 %v4184_v46, %v1692_v9 }
 0x272   :  { %2900 = vmatpush1.bf16.msra.mxu1 %v2899_v49 }
 0x273   :  { %2902 = vmatprep.subr.bf16.mxu1 %v2901_v48 }
 0x276   :  { %2904 = vmatpush1.bf16.msra.mxu1 %v2903_v51 }
 0x277   :  { %2906 = vmatprep.subr.bf16.mxu1 %v2905_v38 }
 0x27a   :  { %2908 = vmatpush1.bf16.msra.mxu1 %v2907_v59 }
 0x27b   :  { %2910 = vmatprep.subr.bf16.mxu1 %v2909_v36 }
 0x27d   :  { %1760 = vmatmul.mubr.f32.vlgmr.msra.gmra.mrb[2].mxu1 %v4173_v52 }
 0x27e   :  { %2912 = vmatpush1.bf16.msra.mxu1 %v2911_v44  ;;  %1870 = vmatprep.mubr.f32.mxu1 %v3805_v30 }
 0x27f   :  { %2914 = vmatprep.subr.bf16.mxu1 %v2913_v8 }
 0x282   :  { %2916 = vmatpush1.bf16.msra.mxu1 %v2915_v29 }
 0x283   :  { %2918 = vmatprep.subr.bf16.mxu1 %v2917_v25 }
 0x286   :  { %2920 = vmatpush1.bf16.msra.mxu1 %v2919_v10 }
 0x287   :  { %2922 = vmatprep.subr.bf16.mxu1 %v2921_v31 }
 0x28a   :  { %2924 = vmatpush1.bf16.msra.mxu1 %v2923_v63 }
 0x28b   :  { %2926 = vmatprep.subr.bf16.mxu1 %v2925_v12 }
 0x28e   :  { %2928 = vmatpush1.bf16.msra.mxu1 %v2927_v23 }
 0x28f   :  { %2930 = vmatprep.subr.bf16.mxu1 %v3780_v56 }
 0x291   :  { %1873 = vmatmul.mubr.f32.vlgmr.msra.gmra.mrb[2].mxu1 %v4176_v43 }
 0x292   :  { %2932 = vmatpush1.bf16.msra.mxu1 %v3791_v45  ;;  %1963 = vmatprep.mubr.f32.mxu1 %v3805_v30 }
 0x293   :  { %2934 = vmatprep.subr.bf16.mxu1 %v3802_v17 }
 0x296   :  { %2936 = vmatpush1.bf16.msra.mxu1 %v3816_v53 }
 0x297   :  { %2938 = vmatprep.subr.bf16.mxu1 %v3819_v13 }
 0x29a   :  { %2940 = vmatpush1.bf16.msra.mxu1 %v3826_v7 }
 0x29b   :  { %2942 = vmatprep.subr.bf16.mxu1 %v3838_v16 }
 0x29e   :  { %2944 = vmatpush1.bf16.msra.mxu1 %v3862_v62 }
 0x29f   :  { %2947 = vmatprep.subr.msk.bf16.mxu1 %vm3370_vm15, %v3853_v60 }
 0x2a2   :  { %2950 = vmatpush1.bf16.msk.msra.mxu1 %vm3370_vm15, %v3887_v0 }
 0x2a3   :  { %2952 = vmatprep.subr.bf16.mxu1 %v4177_v5 }
 0x2a5   :  { %1967 = vmatmul.mubr.f32.vlgmr.msra.gmra.mrb[2].mxu1 %v4178_v3 }
 0x2a6   :  { %2954 = vmatpush1.bf16.msra.mxu1 %v4179_v19  ;;  %2097 = vmatprep.mubr.f32.mxu1 %v3805_v30 }
 0x2a7   :  { %2956 = vmatprep.subr.bf16.mxu1 %v4180_v41 }
 0x2aa   :  { %2958 = vmatpush1.bf16.msra.mxu1 %v4182_v22 }
 0x2ab   :  { %2960 = vmatprep.subr.bf16.mxu1 %v2959_v42 }
 0x2ae   :  { %2962 = vmatpush1.bf16.msra.mxu1 %v2961_v37 }
 0x2af   :  { %2964 = vmatprep.subr.bf16.mxu1 %v4183_v15 }
 0x2b2   :  { %2966 = vmatpush1.bf16.msra.mxu1 %v4185_v18 }
 0x2b3   :  { %2968 = vmatprep.subr.bf16.mxu1 %v2967_v20 }
 0x2b6   :  { %2970 = vmatpush1.bf16.msra.mxu1 %v2969_v11 }
 0x2b7   :  { %2972 = vmatprep.subr.bf16.mxu1 %v3780_v56 }
 0x2b9   :  { %2099 = vmatmul.mubr.f32.vlgmr.msra.gmra.mrb[2].mxu1 %v4173_v52 }
 0x2ba   :  { %2974 = vmatpush1.bf16.msra.mxu1 %v3791_v45  ;;  %2189 = vmatprep.mubr.f32.mxu1 %v3805_v30 }
 0x2bb   :  { %2976 = vmatprep.subr.bf16.mxu1 %v3802_v17 }
 0x2be   :  { %2978 = vmatpush1.bf16.msra.mxu1 %v3816_v53 }
 0x2bf   :  { %2980 = vmatprep.subr.bf16.mxu1 %v3819_v13 }
 0x2c2   :  { %2982 = vmatpush1.bf16.msra.mxu1 %v3826_v7 }
 0x2c3   :  { %2984 = vmatprep.subr.bf16.mxu1 %v3838_v16 }
 0x2c6   :  { %2986 = vmatpush1.bf16.msra.mxu1 %v3862_v62 }
 0x2c7   :  { %2989 = vmatprep.subr.msk.bf16.mxu1 %vm3370_vm15, %v3853_v60 }
 0x2ca   :  { %2992 = vmatpush1.bf16.msk.msra.mxu1 %vm3370_vm15, %v3887_v0 }
 0x2cd   :  { %2191 = vmatmul.mubr.f32.vlgmr.msra.gmra.mrb[2].mxu1 %v4173_v52 }
 0x328   :  { %v1383_v56 = vpop.f32.mrb[0].mxu1 }
 0x329   :  { %v1387_v45 = vmul.f32 0.00390625, %v1383_v56  ;;  %v1385_v17 = vpop.f32.mrb[1].mxu1 }
 0x32b   :  { %v1389_v30 = vsel %vm1388_vm1, %v1387_v45, 0.0 }
 0x32c   :  { %1390 = vst [vmem:[%s4037_s3] sm:$0x7] %v1389_v30 }
 0x3a0   :  { %v2192_v53 = vpop.f32.mrb[2].mxu1 }
 0x3a1   :  { %v2197_v13 = vsel %vm871_vm0, %v2192_v53, -inf  ;;  %v2194_v7 = vpop.f32.mrb[3].mxu1 }
 0x3a2   :  { %v2198_v16 = vrot.slane %v2197_v13, 4  ;;  %v2204_v47 = vsel %vm871_vm0, %v2194_v7, -inf }
 0x3a3   :  { %v2205_v57 = vrot.slane %v2204_v47, 4 }
 0x3a4   :  { %v2199_v60 = vmax.f32 %v2197_v13, %v2198_v16 }
 0x3a5   :  { %v2206_v62 = vmax.f32 %v2204_v47, %v2205_v57 }
 0x3a6   :  { %v2200_v21 = vrot.slane %v2199_v60, 2 }
 0x3a7   :  { %v2207_v1 = vrot.slane %v2206_v62, 2 }
 0x3a8   :  { %v2201_v0 = vmax.f32 %v2199_v60, %v2200_v21 }
 0x3a9   :  { %v2208_v39 = vmax.f32 %v2206_v62, %v2207_v1 }
 0x3aa   :  { %v2202_v2 = vrot.slane %v2201_v0, 1 }
 0x3ab   :  { %v2209_v9 = vrot.slane %v2208_v39, 1 }
 0x3ac   :  { %v2203_v50 = vmax.f32 %v2201_v0, %v2202_v2 }
 0x3ad   :  { %v2210_v32 = vmax.f32 %v2208_v39, %v2209_v9 }
 0x3ae   :  { %v2211_v61 = vsub.f32 %v2192_v53, %v2203_v50 }
 0x3af   :  { %v2212_v4 = vsub.f32 %v2194_v7, %v2210_v32 }
 0x3b0   :  { %v2213_v28 = vmul.f32 1.442695, %v2211_v61 }
 0x3b1   :  { %v2215_v24 = vmul.f32 1.442695, %v2212_v4 }
 0x3b2   :  { %3054 = vpow2.f32 %v2213_v28 }
 0x3b3   :  { %3056 = vpow2.f32 %v2215_v24 }
 0x3bc   :  { %v3055_v49 = vpop.eup %3054 }
 0x3bd   :  { %v3057_v48 = vpop.eup %3056  ;;  %v2217_v34 = vsel %vm871_vm0, %v3055_v49, 0.0 }
 0x3be   :  { %v2218_v27 = vrot.slane %v2217_v34, 4  ;;  %v2224_v51 = vsel %vm871_vm0, %v3057_v48, 0.0 }
 0x3bf   :  { %v2225_v14 = vrot.slane %v2224_v51, 4 }
 0x3c0   :  { %v2219_v38 = vadd.f32 %v2218_v27, %v2217_v34 }
 0x3c1   :  { %v2226_v59 = vadd.f32 %v2225_v14, %v2224_v51 }
 0x3c2   :  { %v2220_v36 = vrot.slane %v2219_v38, 2 }
 0x3c3   :  { %v2227_v44 = vrot.slane %v2226_v59, 2 }
 0x3c4   :  { %v2221_v52 = vadd.f32 %v2220_v36, %v2219_v38 }
 0x3c5   :  { %v2228_v8 = vadd.f32 %v2227_v44, %v2226_v59 }
 0x3c6   :  { %v2222_v29 = vrot.slane %v2221_v52, 1 }
 0x3c7   :  { %v2229_v25 = vrot.slane %v2228_v8, 1 }
 0x3c8   :  { %v2223_v10 = vadd.f32 %v2222_v29, %v2221_v52 }
 0x3c9   :  { %v2230_v31 = vadd.f32 %v2229_v25, %v2228_v8 }
 0x3ca   :  { %3058 = vrcp.f32 %v2223_v10 }
 0x3cb   :  { %3060 = vrcp.f32 %v2230_v31 }
 0x3d4   :  { %v3059_v63 = vpop.eup %3058 }
 0x3d5   :  { %v3061_v54 = vpop.eup %3060  ;;  %v2233_v12 = vmul.f32 %v3059_v63, %v3055_v49 }
 0x3d6   :  { %v2234_v23 = vmul.f32 %v3061_v54, %v3057_v48 }
 0x3d7   :  { %v2313_v43 = vand.u32 4294901760, %v2233_v12 }
 0x3d8   :  { %v2237_v5 = vcombine.low %v2233_v12, %v2234_v23  ;;  %v2307_v3 = vand.u32 4294901760, %v2234_v23 }
 0x3d9   :  { %v2314_v19 = vsub.f32 %v2233_v12, %v2313_v43 }
 0x3da   :  { %2739 = vst [vmem:[%s4036_s2 + $0x8] sm:$0x77] %v2237_v5  ;;  %v2308_v41 = vsub.f32 %v2234_v23, %v2307_v3 }
 0x3db   :  { %v2315_v42 = vand.u32 4294901760, %v2314_v19 }
 0x3dc   :  { %v2309_v22 = vand.u32 4294901760, %v2308_v41 }
 0x3dd   :  { %v2316_v37 = vsub.f32 %v2314_v19, %v2315_v42 }
 0x3de   :  { %v2310_v15 = vsub.f32 %v2308_v41, %v2309_v22 }
 0x3df   :  { %v2317_v20 = vand.u32 4294901760, %v2316_v37 }
 0x3e0   :  { %v2311_v46 = vand.u32 4294901760, %v2310_v15 }
 0x3e2   :  { %2312 = vmatprep.mubr.f32.mxu0 %v2311_v46 }
 0x3e3   :  { %2318 = vmatmul.mubr.f32.vlgmr.msra.gmra.mrb[2].mxu0 %v2317_v20 }
 0x3e4   :  { %2334 = vmatpush1.xpose.msra.mxu0 %v3923_v58  ;;  %2398 = vmatprep.mubr.f32.mxu0 %v2307_v3 }
 0x3e5   :  { %2407 = vmatprep.subr.mxu0 %v4174_v26 }
 0x3eb   :  { %2400 = vmatmul.mubr.f32.vlgmr.msra.gmra.mrb[2].mxu0 %v2313_v43 }
 0x3ec   :  { %2410 = vmatpush1.xpose.msra.mxu0 %v3872_v35  ;;  %2475 = vmatprep.mubr.f32.mxu0 %v2308_v41 }
 0x3ed   :  { %2484 = vmatprep.subr.mxu0 %v3696_v33 }
 0x3f3   :  { %2478 = vmatmul.mubr.f32.vlgmr.msra.gmra.mrb[2].mxu0 %v2314_v19 }
 0x3f4   :  { %2486 = vmatpush1.xpose.msra.mxu0 %v3699_v55  ;;  %2552 = vmatprep.mubr.f32.mxu0 %v2309_v22 }
 0x3f5   :  { %2564 = vmatprep.subr.mxu0 %v4181_v6 }
 0x3fb   :  { %2556 = vmatmul.mubr.f32.vlgmr.msra.gmra.mrb[2].mxu0 %v2315_v42 }
 0x3fc   :  { %2568 = vmatpush1.xpose.msra.mxu0 %v3890_v40  ;;  %2632 = vmatprep.mubr.f32.mxu0 %v2307_v3 }
 0x3fd   :  { %2640 = vmatprep.subr.mxu0 %v3696_v33 }
 0x403   :  { %2634 = vmatmul.mubr.f32.vlgmr.msra.gmra.mrb[2].mxu0 %v2313_v43 }
 0x404   :  { %2642 = vmatpush1.xpose.msra.mxu0 %v3699_v55  ;;  %2706 = vmatprep.mubr.f32.mxu0 %v2307_v3 }
 0x40b   :  { %2708 = vmatmul.mubr.f32.vlgmr.msra.gmra.mrb[2].mxu0 %v2313_v43 }
 0x4de   :  { %v2709_v35 = vpop.f32.mrb[2].mxu0 }
 0x4df   :  { %v2713_v58 = vmul.f32 0.00390625, %v2709_v35  ;;  %v2711_v26 = vpop.f32.mrb[3].mxu0 }
 0x4e1   :  { %v2714_v18 = vsel %vm1388_vm1, %v2713_v58, 0.0 }
 0x4e2   :  { %2740 = vst [vmem:[%s4037_s3 + $0x4] sm:$0x7] %v2714_v18 }

</bundles_post_ra>
